<compile_context>
chip_gen: v6e
topology: v6e:2x2x1
jax: 0.10.0
libtpu: 0.0.40
codegen_flags: <defaults>
</compile_context>

<pallas_src>
import math
import functools

import jax
import jax.numpy as jnp
from jax.experimental import pallas as pl
from jax.experimental.pallas import tpu as pltpu  # noqa: F401  (kept for TPU-specific tuning hooks)

# ----------------------------- model hyper-parameters ------------------------------
NINP = 32        # d_model per direction
NHEAD = 2
NHID = 32        # feed-forward hidden per direction
NLAYERS = 2
BATCH = 2
SEQ = 16
NDIR = 2         # forward / backward streams
LN_EPS = 1e-5
MASK_NEG = -1e9      # finite "minus infinity" for the additive attention mask
DENOM_EPS = 1e-12    # keeps fully-masked (cross-batch) groups at exactly 0, not 0*inf


# ---------------------------------- Pallas kernel ----------------------------------
def fused_transformer_kernel(xq_ref, xs_ref, amask_ref, hexp_ref, blk_ref,
                             wa_ref, wb_ref, vec_ref, o_ref, *, nlayers, nhead):
    """Whole forward (both directions, both layers, full batch) in one step.

    xq_ref   : (B*S, 2D)       pos-encoded query stream, lanes [fwd | bwd]
    xs_ref   : (B*S, 2D)       pos-encoded src (key/value) stream
    amask_ref: (B*S, G*S)      additive mask; G = NDIR*NHEAD*B groups of S keys
    hexp_ref : (G*S, 4D)       per-group lane mask for the tiled [K|V] expansion
    blk_ref  : (G*S, G*S)      same-group indicator for per-group softmax sums
    wa_ref   : (2D, 2*L*4D)    [Wkv_l0 | .. | Wkv_l{L-1} | Wq_pad_l0 | ..]  (128-aligned)
    wb_ref   : (L*8D + 2D, 2D) per layer rows [Wo_pad(4D); W1(2D); W2(2D)], then LN-avg
    vec_ref  : (1+8L, L*4D)    rows: bkv_all, then per layer bq_pad,bo,b1,b2,g1,be1,g2,be2
    o_ref    : (B*S, 2D)       relu-clamped output, lanes [0:D)=fwd, [D:2D)=bwd
    """
    f32 = jnp.float32
    r, dd = xq_ref.shape                # (B*S, 2*D)
    gs = blk_ref.shape[0]               # G*S
    rep = gs // r                       # NDIR * NHEAD copies in the K/V expansion
    d = dd // 2
    hd = d // nhead
    kvw = 2 * dd                        # fused [K|V] lane width = 4*D
    per_layer_rows = kvw + 2 * dd       # Wo_pad + W1 + W2 rows per layer
    scale = 1.0 / math.sqrt(hd)

    x = xq_ref[...]                     # (R, 2D) query-stream activations (layer input)
    src = xs_ref[...]                   # (R, 2D) key/value stream (constant across layers)
    amask = amask_ref[...]              # (R, GS)
    hexp = hexp_ref[...]                # (GS, 4D)
    blk = blk_ref[...]                  # (GS, GS)
    wa = wa_ref[...]
    wb = wb_ref[...]
    vec = vec_ref[...]

    ln_avg = wb[nlayers * per_layer_rows:nlayers * per_layer_rows + dd, :]   # (2D, 2D)

    def layer_norm(v, gamma, beta):
        # Per-direction LayerNorm over D lanes via the block-averaging matrix:
        # one MXU op each for mean and variance -> no unaligned lane slicing.
        mu = jnp.dot(v, ln_avg, preferred_element_type=f32)
        dv = v - mu
        var = jnp.dot(dv * dv, ln_avg, preferred_element_type=f32)
        return dv * jax.lax.rsqrt(var + LN_EPS) * gamma + beta

    # Hoisted K/V projection for ALL layers: src is constant across layers, so one
    # lane-dense (R, 2D) x (2D, L*4D) matmul replaces 2*L narrower ones.
    wkv_all = wa[:, :nlayers * kvw]                    # lane offset 0
    bkv_all = vec[0:1, :nlayers * kvw]                 # (1, L*4D)
    kv_all = jnp.dot(src, wkv_all, preferred_element_type=f32) + bkv_all    # (R, L*4D)

    for l in range(nlayers):
        # ----- per-layer parameter views (row slices / 128-aligned lane slices only) -----
        q_off = nlayers * kvw + l * kvw
        wq_pad = wa[:, q_off:q_off + kvw]              # (2D, 4D): [Wq_bd | 0]
        rb = l * per_layer_rows
        wo_pad = wb[rb:rb + kvw, :]                    # (4D, 2D): [0 ; Wo_bd]
        w1 = wb[rb + kvw:rb + kvw + dd, :]             # (2D, 2D)
        w2 = wb[rb + kvw + dd:rb + kvw + 2 * dd, :]    # (2D, 2D)
        vr = 1 + 8 * l
        bq_pad = vec[vr + 0:vr + 1, :kvw]              # (1, 4D): [bq_bd | 0]
        bo = vec[vr + 1:vr + 2, :dd]
        b1 = vec[vr + 2:vr + 3, :dd]
        b2 = vec[vr + 3:vr + 4, :dd]
        g1 = vec[vr + 4:vr + 5, :dd]
        be1 = vec[vr + 5:vr + 6, :dd]
        g2 = vec[vr + 6:vr + 7, :dd]
        be2 = vec[vr + 7:vr + 8, :dd]

        # ----- attention: all (direction, head, batch) groups fused into single matmuls -----
        # q_pad lanes [2D:4D) are exactly zero, so contracting against the tiled [K|V]
        # expansion picks up only the K half -> K never has to be sliced out of [K|V].
        q_pad = jnp.dot(x, wq_pad, preferred_element_type=f32) + bq_pad     # (R, 4D)
        kv_l = kv_all[:, l * kvw:(l + 1) * kvw]                             # (R, 4D), aligned
        kvexp = jnp.concatenate([kv_l] * rep, axis=0) * hexp                # (GS, 4D)

        sc = jax.lax.dot_general(q_pad, kvexp, (((1,), (1,)), ((), ())),
                                 preferred_element_type=f32)                # (R, GS)
        sc = sc * scale + amask
        sc = sc - jnp.max(sc, axis=-1, keepdims=True)     # global shift; per-group
        p = jnp.exp(sc)                                   # softmax is shift-invariant
        denom = jnp.dot(p, blk, preferred_element_type=f32)        # per-group sums
        p = p * pl.reciprocal(denom + DENOM_EPS, approx=True)
        # ctx_full lanes [0:2D) hold p@Kexp (unused; killed by the zero rows of Wo_pad),
        # lanes [2D:4D) hold each (direction, head) context already in its final lane slot.
        ctx_full = jnp.dot(p, kvexp, preferred_element_type=f32)            # (R, 4D)

        attn = jnp.dot(ctx_full, wo_pad, preferred_element_type=f32) + bo   # (R, 2D)
        y = layer_norm(x + attn, g1, be1)
        ff = jnp.maximum(jnp.dot(y, w1, preferred_element_type=f32) + b1, 0.0)
        ff = jnp.dot(ff, w2, preferred_element_type=f32) + b2
        x = layer_norm(y + ff, g2, be2)

    o_ref[...] = jnp.maximum(x, 0.0)    # final .clamp(min=0); lanes [0:D)=fwd, [D:2D)=bwd


# -------------------------- one-time setup (outside the jit) ------------------------
def positional_encoding(max_len, d_model):
    pos = jnp.arange(max_len, dtype=jnp.float32)[:, None]
    div = jnp.exp(jnp.arange(0, d_model, 2, dtype=jnp.float32)
                  * (-math.log(10000.0) / d_model))
    pe = jnp.zeros((max_len, d_model), jnp.float32)
    pe = pe.at[:, 0::2].set(jnp.sin(pos * div))
    pe = pe.at[:, 1::2].set(jnp.cos(pos * div))
    return pe


def make_layer_params(key, d, h):
    ks = jax.random.split(key, 6)
    w = lambda k_, shp: jax.random.normal(k_, shp, jnp.float32) * 0.08
    z = lambda n: jnp.zeros((n,), jnp.float32)
    return dict(
        wq=w(ks[0], (d, d)), bq=z(d),
        wk=w(ks[1], (d, d)), bk=z(d),
        wv=w(ks[2], (d, d)), bv=z(d),
        wo=w(ks[3], (d, d)), bo=z(d),
        w1=w(ks[4], (d, h)), b1=z(h),
        w2=w(ks[5], (h, d)), b2=z(d),
        g1=jnp.ones((d,), jnp.float32), beta1=z(d),
        g2=jnp.ones((d,), jnp.float32), beta2=z(d),
    )


def _block_diag(a, b):
    m0, n0 = a.shape
    m1, n1 = b.shape
    top = jnp.concatenate([a, jnp.zeros((m0, n1), a.dtype)], axis=1)
    bot = jnp.concatenate([jnp.zeros((m1, n0), b.dtype), b], axis=1)
    return jnp.concatenate([top, bot], axis=0)


def pack_params(params_fwd, params_bwd):
    """Pack both directions' parameters into 3 kernel slabs (done once at setup).

    Every matrix is block-diagonal over {fwd, bwd}; Wq is zero-padded to 4D lanes and
    Wo zero-padded on its K-half rows so the kernel never needs unaligned lane slices.
    """
    d = params_fwd[0]["wq"].shape[0]
    dd, kvw = 2 * d, 4 * d
    nlayers = len(params_fwd)
    zdd = jnp.zeros((dd, dd), jnp.float32)

    wkv_cols, wq_cols, wb_rows, vec_rows, bkv_row = [], [], [], [], []
    for pf, pb in zip(params_fwd, params_bwd):
        wq_bd = _block_diag(pf["wq"], pb["wq"])
        wk_bd = _block_diag(pf["wk"], pb["wk"])
        wv_bd = _block_diag(pf["wv"], pb["wv"])
        wo_bd = _block_diag(pf["wo"], pb["wo"])
        w1_bd = _block_diag(pf["w1"], pb["w1"])
        w2_bd = _block_diag(pf["w2"], pb["w2"])

        wkv_cols.append(jnp.concatenate([wk_bd, wv_bd], axis=1))      # (2D, 4D)
        wq_cols.append(jnp.concatenate([wq_bd, zdd], axis=1))         # (2D, 4D)
        wb_rows += [jnp.concatenate([zdd, wo_bd], axis=0),            # (4D, 2D)
                    w1_bd, w2_bd]                                      # (2D, 2D) each

        bkv_row.append(jnp.concatenate([pf["bk"], pb["bk"], pf["bv"], pb["bv"]]))   # (4D,)
        vec_rows.append(jnp.concatenate([pf["bq"], pb["bq"],
                                         jnp.zeros((dd,), jnp.float32)]))           # (4D,)
        for name in ("bo", "b1", "b2", "g1", "beta1", "g2", "beta2"):
            vec_rows.append(jnp.concatenate([pf[name], pb[name]]))                  # (2D,)

    # Per-direction LayerNorm averaging matrix, appended to the row-stacked slab.
    half = (jnp.arange(dd)[:, None] // d) == (jnp.arange(dd)[None, :] // d)
    wb_rows.append(half.astype(jnp.float32) / d)

    wa = jnp.concatenate(wkv_cols + wq_cols, axis=1)                   # (2D, 2*L*4D)
    wb = jnp.concatenate(wb_rows, axis=0)                              # (L*8D + 2D, 2D)

    vec = jnp.zeros((1 + 8 * nlayers, nlayers * kvw), jnp.float32)
    vec = vec.at[0, :].set(jnp.concatenate(bkv_row))
    for i, row in enumerate(vec_rows):
        vec = vec.at[1 + i, :row.shape[0]].set(row)
    return wa, wb, vec


def build_attention_constants(batch, seq, d, nhead, ndir=NDIR):
    """Static (shape-only) attention constants, built once outside the jitted forward."""
    hd = d // nhead
    r = batch * seq
    gs = ndir * nhead * batch * seq

    # Eval-mode _generate_square_subsequent_mask: strictly causal / anticausal with the
    # diagonal patched at rows {0, seq-1} (finite MASK_NEG instead of -inf).
    i = jnp.arange(seq)[:, None]
    j = jnp.arange(seq)[None, :]
    fwd = jnp.where(j < i, 0.0, MASK_NEG).astype(jnp.float32)
    bwd = jnp.where(j > i, 0.0, MASK_NEG).astype(jnp.float32)
    ends = jnp.array([0, seq - 1])
    fwd = fwd.at[ends, ends].set(0.0)
    bwd = bwd.at[ends, ends].set(0.0)

    # Additive mask over all (direction, head, batch) key groups; cross-batch blocks killed.
    amask = jnp.full((r, gs), MASK_NEG, jnp.float32)
    hexp = jnp.zeros((gs, 4 * d), jnp.float32)
    for dir_i, dm in enumerate((fwd, bwd)):
        for h in range(nhead):
            c = dir_i * nhead + h
            k0 = dir_i * d + h * hd
            hexp = hexp.at[c * r:(c + 1) * r, k0:k0 + hd].set(1.0)
            hexp = hexp.at[c * r:(c + 1) * r, 2 * d + k0:2 * d + k0 + hd].set(1.0)
            for b in range(batch):
                grp = c * batch + b
                amask = amask.at[b * seq:(b + 1) * seq,
                                 grp * seq:(grp + 1) * seq].set(dm)

    gid = jnp.arange(gs) // seq
    blk = (gid[:, None] == gid[None, :]).astype(jnp.float32)

    # Columns {0, seq-1} of the returned loss mask get zeroed (the to_remove rows).
    col_keep = jnp.ones((1, seq), jnp.float32).at[0, ends].set(0.0)
    return amask, hexp, blk, col_keep


# ------------------------------------ JAX glue -------------------------------------
def transformer_conv_forward(src_fwd_in, src_bwd_in, q_fwd_in, q_bwd_in, loss_mask,
                             wa, wb, vec, amask, hexp, blk, col_keep, pe2):
    """Eval-mode forward.  Everything except the (B,D,S)->(B,S,D) input transpose + PE add
    (one tiny XLA fusion) runs inside a single-step Pallas kernel."""
    B, D, S = src_fwd_in.shape

    def prep(fwd, bwd):  # (B, D, S) x2 -> (B*S, 2D) with positional encoding added
        f = jnp.transpose(fwd, (0, 2, 1)).reshape(B * S, D)
        b = jnp.transpose(bwd, (0, 2, 1)).reshape(B * S, D)
        return jnp.concatenate([f, b], axis=1) + pe2

    xq = prep(q_fwd_in, q_bwd_in)        # query stream
    xs = prep(src_fwd_in, src_bwd_in)    # key/value stream

    kern = functools.partial(fused_transformer_kernel, nlayers=NLAYERS, nhead=NHEAD)
    out = pl.pallas_call(                # single step: whole arrays in VMEM, one DMA each
        kern,
        out_shape=jax.ShapeDtypeStruct((B * S, 2 * D), jnp.float32),
    )(xq, xs, amask, hexp, blk, wa, wb, vec)

    output = out.reshape(B, S, 2 * D)    # row-major reshape == fwd/bwd feature concat
    return output, loss_mask * col_keep


# -------------------------------------- main ---------------------------------------
if __name__ == "__main__":
    key = jax.random.PRNGKey(0)
    k_in, k_pf, k_pb = jax.random.split(key, 3)
    k1, k2, k3, k4, k5 = jax.random.split(k_in, 5)

    src_forward_in = jax.random.normal(k1, (BATCH, NINP, SEQ), jnp.float32)
    src_backward_in = jax.random.normal(k2, (BATCH, NINP, SEQ), jnp.float32)
    query_forward = jax.random.normal(k3, (BATCH, NINP, SEQ), jnp.float32)
    query_backward = jax.random.normal(k4, (BATCH, NINP, SEQ), jnp.float32)
    loss_mask = (jax.random.uniform(k5, (BATCH, SEQ)) > 0.2).astype(jnp.float32)

    params_fwd = [make_layer_params(jax.random.fold_in(k_pf, i), NINP, NHID)
                  for i in range(NLAYERS)]
    params_bwd = [make_layer_params(jax.random.fold_in(k_pb, i), NINP, NHID)
                  for i in range(NLAYERS)]

    # One-time setup: parameter packing, masks, positional encoding (not per forward call).
    wa, wb, vec = pack_params(params_fwd, params_bwd)
    amask, hexp, blk, col_keep = build_attention_constants(BATCH, SEQ, NINP, NHEAD)
    pe2 = jnp.tile(positional_encoding(SEQ, NINP), (BATCH, 2))   # (B*S, 2D), both lane halves

    fwd_fn = jax.jit(transformer_conv_forward)
    out, out_mask = fwd_fn(src_forward_in, src_backward_in, query_forward, query_backward,
                           loss_mask, wa, wb, vec, amask, hexp, blk, col_keep, pe2)
    out = jax.block_until_ready(out)
    out_mask = jax.block_until_ready(out_mask)

    assert out.shape == (BATCH, SEQ, 2 * NINP)
    assert out_mask.shape == (BATCH, SEQ)
    assert bool(jnp.all(jnp.isfinite(out)))
    print("KERNEL_OK")
</pallas_src>

<mosaic_0001>
module attributes {stable_mosaic.version = 11 : i64} {
  func.func @fused_transformer_kernel(%arg0: memref<32x64xf32, #tpu.memory_space<vmem>>, %arg1: memref<32x64xf32, #tpu.memory_space<vmem>>, %arg2: memref<32x128xf32, #tpu.memory_space<vmem>>, %arg3: memref<128x128xf32, #tpu.memory_space<vmem>>, %arg4: memref<128x128xf32, #tpu.memory_space<vmem>>, %arg5: memref<64x512xf32, #tpu.memory_space<vmem>>, %arg6: memref<576x64xf32, #tpu.memory_space<vmem>>, %arg7: memref<17x256xf32, #tpu.memory_space<vmem>>, %arg8: memref<32x64xf32, #tpu.memory_space<vmem>>) attributes {dimension_semantics = [], scalar_prefetch = 0 : i64, scratch_operands = 0 : i64, tpu.core_type = #tpu.core_type<tc>} {
    %c0 = arith.constant 0 : index
    %c0_0 = arith.constant 0 : index
    %0 = vector.load %arg0[%c0, %c0_0] : memref<32x64xf32, #tpu.memory_space<vmem>>, vector<32x64xf32>
    %c0_1 = arith.constant 0 : index
    %c0_2 = arith.constant 0 : index
    %1 = vector.load %arg1[%c0_1, %c0_2] : memref<32x64xf32, #tpu.memory_space<vmem>>, vector<32x64xf32>
    %c0_3 = arith.constant 0 : index
    %c0_4 = arith.constant 0 : index
    %2 = vector.load %arg2[%c0_3, %c0_4] : memref<32x128xf32, #tpu.memory_space<vmem>>, vector<32x128xf32>
    %c0_5 = arith.constant 0 : index
    %c0_6 = arith.constant 0 : index
    %3 = vector.load %arg3[%c0_5, %c0_6] : memref<128x128xf32, #tpu.memory_space<vmem>>, vector<128x128xf32>
    %c0_7 = arith.constant 0 : index
    %c0_8 = arith.constant 0 : index
    %4 = vector.load %arg4[%c0_7, %c0_8] : memref<128x128xf32, #tpu.memory_space<vmem>>, vector<128x128xf32>
    %c0_9 = arith.constant 0 : index
    %c0_10 = arith.constant 0 : index
    %5 = vector.load %arg5[%c0_9, %c0_10] : memref<64x512xf32, #tpu.memory_space<vmem>>, vector<64x512xf32>
    %c0_11 = arith.constant 0 : index
    %c0_12 = arith.constant 0 : index
    %6 = vector.load %arg6[%c0_11, %c0_12] : memref<576x64xf32, #tpu.memory_space<vmem>>, vector<576x64xf32>
    %c0_13 = arith.constant 0 : index
    %c0_14 = arith.constant 0 : index
    %7 = vector.load %arg7[%c0_13, %c0_14] : memref<17x256xf32, #tpu.memory_space<vmem>>, vector<17x256xf32>
    %8 = vector.extract_strided_slice %6 {offsets = [512, 0], sizes = [64, 64], strides = [1, 1]} : vector<576x64xf32> to vector<64x64xf32>
    %9 = vector.extract_strided_slice %5 {offsets = [0, 0], sizes = [64, 256], strides = [1, 1]} : vector<64x512xf32> to vector<64x256xf32>
    %10 = vector.extract_strided_slice %7 {offsets = [0, 0], sizes = [1, 256], strides = [1, 1]} : vector<17x256xf32> to vector<1x256xf32>
    %cst = arith.constant dense<0.000000e+00> : vector<32x256xf32>
    %11 = tpu.matmul %1, %9, %cst {dimension_numbers = #tpu.dot_dimension_numbers<[1], [0], [0], [1], [0, 0, 1, 1], [], []>} : vector<32x64xf32>, vector<64x256xf32>, vector<32x256xf32> -> vector<32x256xf32>
    %12 = vector.broadcast %10 : vector<1x256xf32> to vector<32x256xf32>
    %13 = arith.addf %11, %12 : vector<32x256xf32>
    %14 = vector.extract_strided_slice %5 {offsets = [0, 256], sizes = [64, 128], strides = [1, 1]} : vector<64x512xf32> to vector<64x128xf32>
    %15 = vector.extract_strided_slice %6 {offsets = [0, 0], sizes = [128, 64], strides = [1, 1]} : vector<576x64xf32> to vector<128x64xf32>
    %16 = vector.extract_strided_slice %6 {offsets = [128, 0], sizes = [64, 64], strides = [1, 1]} : vector<576x64xf32> to vector<64x64xf32>
    %17 = vector.extract_strided_slice %6 {offsets = [192, 0], sizes = [64, 64], strides = [1, 1]} : vector<576x64xf32> to vector<64x64xf32>
    %18 = vector.extract_strided_slice %7 {offsets = [1, 0], sizes = [1, 128], strides = [1, 1]} : vector<17x256xf32> to vector<1x128xf32>
    %19 = vector.extract_strided_slice %7 {offsets = [2, 0], sizes = [1, 64], strides = [1, 1]} : vector<17x256xf32> to vector<1x64xf32>
    %20 = vector.extract_strided_slice %7 {offsets = [3, 0], sizes = [1, 64], strides = [1, 1]} : vector<17x256xf32> to vector<1x64xf32>
    %21 = vector.extract_strided_slice %7 {offsets = [4, 0], sizes = [1, 64], strides = [1, 1]} : vector<17x256xf32> to vector<1x64xf32>
    %22 = vector.extract_strided_slice %7 {offsets = [5, 0], sizes = [1, 64], strides = [1, 1]} : vector<17x256xf32> to vector<1x64xf32>
    %23 = vector.extract_strided_slice %7 {offsets = [6, 0], sizes = [1, 64], strides = [1, 1]} : vector<17x256xf32> to vector<1x64xf32>
    %24 = vector.extract_strided_slice %7 {offsets = [7, 0], sizes = [1, 64], strides = [1, 1]} : vector<17x256xf32> to vector<1x64xf32>
    %25 = vector.extract_strided_slice %7 {offsets = [8, 0], sizes = [1, 64], strides = [1, 1]} : vector<17x256xf32> to vector<1x64xf32>
    %cst_15 = arith.constant dense<0.000000e+00> : vector<32x128xf32>
    %26 = tpu.matmul %0, %14, %cst_15 {dimension_numbers = #tpu.dot_dimension_numbers<[1], [0], [0], [1], [0, 0, 1, 1], [], []>} : vector<32x64xf32>, vector<64x128xf32>, vector<32x128xf32> -> vector<32x128xf32>
    %27 = vector.broadcast %18 : vector<1x128xf32> to vector<32x128xf32>
    %28 = arith.addf %26, %27 : vector<32x128xf32>
    %29 = vector.extract_strided_slice %13 {offsets = [0, 0], sizes = [32, 128], strides = [1, 1]} : vector<32x256xf32> to vector<32x128xf32>
    %30 = tpu.concatenate %29, %29, %29, %29 in 0 : vector<32x128xf32>, vector<32x128xf32>, vector<32x128xf32>, vector<32x128xf32> -> vector<128x128xf32>
    %31 = arith.mulf %30, %3 : vector<128x128xf32>
    %cst_16 = arith.constant dense<0.000000e+00> : vector<32x128xf32>
    %32 = tpu.matmul %28, %31, %cst_16 {dimension_numbers = #tpu.dot_dimension_numbers<[1], [1], [0], [0], [0, 0, 1, 0], [], []>} : vector<32x128xf32>, vector<128x128xf32>, vector<32x128xf32> -> vector<32x128xf32>
    %cst_17 = arith.constant 2.500000e-01 : f32
    %33 = vector.broadcast %cst_17 : f32 to vector<32x128xf32>
    %34 = arith.mulf %32, %33 : vector<32x128xf32>
    %35 = arith.addf %34, %2 : vector<32x128xf32>
    %cst_18 = arith.constant dense<0xFF800000> : vector<32xf32>
    %36 = vector.multi_reduction <maximumf>, %35, %cst_18 [1] : vector<32x128xf32> to vector<32xf32>
    %37 = vector.shape_cast %36 : vector<32xf32> to vector<32x1xf32>
    %38 = vector.broadcast %37 : vector<32x1xf32> to vector<32x128xf32>
    %39 = arith.subf %35, %38 : vector<32x128xf32>
    %40 = math.exp %39 : vector<32x128xf32>
    %cst_19 = arith.constant dense<0.000000e+00> : vector<32x128xf32>
    %41 = tpu.matmul %40, %4, %cst_19 {dimension_numbers = #tpu.dot_dimension_numbers<[1], [0], [0], [1], [0, 0, 1, 1], [], []>} : vector<32x128xf32>, vector<128x128xf32>, vector<32x128xf32> -> vector<32x128xf32>
    %cst_20 = arith.constant 9.99999996E-13 : f32
    %42 = vector.broadcast %cst_20 : f32 to vector<32x128xf32>
    %43 = arith.addf %41, %42 : vector<32x128xf32>
    %44 = tpu.reciprocal %43 {approx = true} : vector<32x128xf32> -> vector<32x128xf32>
    %45 = arith.mulf %40, %44 : vector<32x128xf32>
    %cst_21 = arith.constant dense<0.000000e+00> : vector<32x128xf32>
    %46 = tpu.matmul %45, %31, %cst_21 {dimension_numbers = #tpu.dot_dimension_numbers<[1], [0], [0], [1], [0, 0, 1, 1], [], []>} : vector<32x128xf32>, vector<128x128xf32>, vector<32x128xf32> -> vector<32x128xf32>
    %cst_22 = arith.constant dense<0.000000e+00> : vector<32x64xf32>
    %47 = tpu.matmul %46, %15, %cst_22 {dimension_numbers = #tpu.dot_dimension_numbers<[1], [0], [0], [1], [0, 0, 1, 1], [], []>} : vector<32x128xf32>, vector<128x64xf32>, vector<32x64xf32> -> vector<32x64xf32>
    %48 = vector.broadcast %19 : vector<1x64xf32> to vector<32x64xf32>
    %49 = arith.addf %47, %48 : vector<32x64xf32>
    %50 = arith.addf %0, %49 : vector<32x64xf32>
    %cst_23 = arith.constant dense<0.000000e+00> : vector<32x64xf32>
    %51 = tpu.matmul %50, %8, %cst_23 {dimension_numbers = #tpu.dot_dimension_numbers<[1], [0], [0], [1], [0, 0, 1, 1], [], []>} : vector<32x64xf32>, vector<64x64xf32>, vector<32x64xf32> -> vector<32x64xf32>
    %52 = arith.subf %50, %51 : vector<32x64xf32>
    %53 = arith.mulf %52, %52 : vector<32x64xf32>
    %cst_24 = arith.constant dense<0.000000e+00> : vector<32x64xf32>
    %54 = tpu.matmul %53, %8, %cst_24 {dimension_numbers = #tpu.dot_dimension_numbers<[1], [0], [0], [1], [0, 0, 1, 1], [], []>} : vector<32x64xf32>, vector<64x64xf32>, vector<32x64xf32> -> vector<32x64xf32>
    %cst_25 = arith.constant 9.99999974E-6 : f32
    %55 = vector.broadcast %cst_25 : f32 to vector<32x64xf32>
    %56 = arith.addf %54, %55 : vector<32x64xf32>
    %57 = math.rsqrt %56 : vector<32x64xf32>
    %58 = arith.mulf %52, %57 : vector<32x64xf32>
    %59 = vector.broadcast %22 : vector<1x64xf32> to vector<32x64xf32>
    %60 = arith.mulf %58, %59 : vector<32x64xf32>
    %61 = vector.broadcast %23 : vector<1x64xf32> to vector<32x64xf32>
    %62 = arith.addf %60, %61 : vector<32x64xf32>
    %cst_26 = arith.constant dense<0.000000e+00> : vector<32x64xf32>
    %63 = tpu.matmul %62, %16, %cst_26 {dimension_numbers = #tpu.dot_dimension_numbers<[1], [0], [0], [1], [0, 0, 1, 1], [], []>} : vector<32x64xf32>, vector<64x64xf32>, vector<32x64xf32> -> vector<32x64xf32>
    %64 = vector.broadcast %20 : vector<1x64xf32> to vector<32x64xf32>
    %65 = arith.addf %63, %64 : vector<32x64xf32>
    %cst_27 = arith.constant 0.000000e+00 : f32
    %66 = vector.broadcast %cst_27 : f32 to vector<32x64xf32>
    %67 = arith.maximumf %65, %66 : vector<32x64xf32>
    %cst_28 = arith.constant dense<0.000000e+00> : vector<32x64xf32>
    %68 = tpu.matmul %67, %17, %cst_28 {dimension_numbers = #tpu.dot_dimension_numbers<[1], [0], [0], [1], [0, 0, 1, 1], [], []>} : vector<32x64xf32>, vector<64x64xf32>, vector<32x64xf32> -> vector<32x64xf32>
    %69 = vector.broadcast %21 : vector<1x64xf32> to vector<32x64xf32>
    %70 = arith.addf %68, %69 : vector<32x64xf32>
    %71 = arith.addf %62, %70 : vector<32x64xf32>
    %cst_29 = arith.constant dense<0.000000e+00> : vector<32x64xf32>
    %72 = tpu.matmul %71, %8, %cst_29 {dimension_numbers = #tpu.dot_dimension_numbers<[1], [0], [0], [1], [0, 0, 1, 1], [], []>} : vector<32x64xf32>, vector<64x64xf32>, vector<32x64xf32> -> vector<32x64xf32>
    %73 = arith.subf %71, %72 : vector<32x64xf32>
    %74 = arith.mulf %73, %73 : vector<32x64xf32>
    %cst_30 = arith.constant dense<0.000000e+00> : vector<32x64xf32>
    %75 = tpu.matmul %74, %8, %cst_30 {dimension_numbers = #tpu.dot_dimension_numbers<[1], [0], [0], [1], [0, 0, 1, 1], [], []>} : vector<32x64xf32>, vector<64x64xf32>, vector<32x64xf32> -> vector<32x64xf32>
    %cst_31 = arith.constant 9.99999974E-6 : f32
    %76 = vector.broadcast %cst_31 : f32 to vector<32x64xf32>
    %77 = arith.addf %75, %76 : vector<32x64xf32>
    %78 = math.rsqrt %77 : vector<32x64xf32>
    %79 = arith.mulf %73, %78 : vector<32x64xf32>
    %80 = vector.broadcast %24 : vector<1x64xf32> to vector<32x64xf32>
    %81 = arith.mulf %79, %80 : vector<32x64xf32>
    %82 = vector.broadcast %25 : vector<1x64xf32> to vector<32x64xf32>
    %83 = arith.addf %81, %82 : vector<32x64xf32>
    %84 = vector.extract_strided_slice %5 {offsets = [0, 384], sizes = [64, 128], strides = [1, 1]} : vector<64x512xf32> to vector<64x128xf32>
    %85 = vector.extract_strided_slice %6 {offsets = [256, 0], sizes = [128, 64], strides = [1, 1]} : vector<576x64xf32> to vector<128x64xf32>
    %86 = vector.extract_strided_slice %6 {offsets = [384, 0], sizes = [64, 64], strides = [1, 1]} : vector<576x64xf32> to vector<64x64xf32>
    %87 = vector.extract_strided_slice %6 {offsets = [448, 0], sizes = [64, 64], strides = [1, 1]} : vector<576x64xf32> to vector<64x64xf32>
    %88 = vector.extract_strided_slice %7 {offsets = [9, 0], sizes = [1, 128], strides = [1, 1]} : vector<17x256xf32> to vector<1x128xf32>
    %89 = vector.extract_strided_slice %7 {offsets = [10, 0], sizes = [1, 64], strides = [1, 1]} : vector<17x256xf32> to vector<1x64xf32>
    %90 = vector.extract_strided_slice %7 {offsets = [11, 0], sizes = [1, 64], strides = [1, 1]} : vector<17x256xf32> to vector<1x64xf32>
    %91 = vector.extract_strided_slice %7 {offsets = [12, 0], sizes = [1, 64], strides = [1, 1]} : vector<17x256xf32> to vector<1x64xf32>
    %92 = vector.extract_strided_slice %7 {offsets = [13, 0], sizes = [1, 64], strides = [1, 1]} : vector<17x256xf32> to vector<1x64xf32>
    %93 = vector.extract_strided_slice %7 {offsets = [14, 0], sizes = [1, 64], strides = [1, 1]} : vector<17x256xf32> to vector<1x64xf32>
    %94 = vector.extract_strided_slice %7 {offsets = [15, 0], sizes = [1, 64], strides = [1, 1]} : vector<17x256xf32> to vector<1x64xf32>
    %95 = vector.extract_strided_slice %7 {offsets = [16, 0], sizes = [1, 64], strides = [1, 1]} : vector<17x256xf32> to vector<1x64xf32>
    %cst_32 = arith.constant dense<0.000000e+00> : vector<32x128xf32>
    %96 = tpu.matmul %83, %84, %cst_32 {dimension_numbers = #tpu.dot_dimension_numbers<[1], [0], [0], [1], [0, 0, 1, 1], [], []>} : vector<32x64xf32>, vector<64x128xf32>, vector<32x128xf32> -> vector<32x128xf32>
    %97 = vector.broadcast %88 : vector<1x128xf32> to vector<32x128xf32>
    %98 = arith.addf %96, %97 : vector<32x128xf32>
    %99 = vector.extract_strided_slice %13 {offsets = [0, 128], sizes = [32, 128], strides = [1, 1]} : vector<32x256xf32> to vector<32x128xf32>
    %100 = tpu.concatenate %99, %99, %99, %99 in 0 : vector<32x128xf32>, vector<32x128xf32>, vector<32x128xf32>, vector<32x128xf32> -> vector<128x128xf32>
    %101 = arith.mulf %100, %3 : vector<128x128xf32>
    %cst_33 = arith.constant dense<0.000000e+00> : vector<32x128xf32>
    %102 = tpu.matmul %98, %101, %cst_33 {dimension_numbers = #tpu.dot_dimension_numbers<[1], [1], [0], [0], [0, 0, 1, 0], [], []>} : vector<32x128xf32>, vector<128x128xf32>, vector<32x128xf32> -> vector<32x128xf32>
    %cst_34 = arith.constant 2.500000e-01 : f32
    %103 = vector.broadcast %cst_34 : f32 to vector<32x128xf32>
    %104 = arith.mulf %102, %103 : vector<32x128xf32>
    %105 = arith.addf %104, %2 : vector<32x128xf32>
    %cst_35 = arith.constant dense<0xFF800000> : vector<32xf32>
    %106 = vector.multi_reduction <maximumf>, %105, %cst_35 [1] : vector<32x128xf32> to vector<32xf32>
    %107 = vector.shape_cast %106 : vector<32xf32> to vector<32x1xf32>
    %108 = vector.broadcast %107 : vector<32x1xf32> to vector<32x128xf32>
    %109 = arith.subf %105, %108 : vector<32x128xf32>
    %110 = math.exp %109 : vector<32x128xf32>
    %cst_36 = arith.constant dense<0.000000e+00> : vector<32x128xf32>
    %111 = tpu.matmul %110, %4, %cst_36 {dimension_numbers = #tpu.dot_dimension_numbers<[1], [0], [0], [1], [0, 0, 1, 1], [], []>} : vector<32x128xf32>, vector<128x128xf32>, vector<32x128xf32> -> vector<32x128xf32>
    %cst_37 = arith.constant 9.99999996E-13 : f32
    %112 = vector.broadcast %cst_37 : f32 to vector<32x128xf32>
    %113 = arith.addf %111, %112 : vector<32x128xf32>
    %114 = tpu.reciprocal %113 {approx = true} : vector<32x128xf32> -> vector<32x128xf32>
    %115 = arith.mulf %110, %114 : vector<32x128xf32>
    %cst_38 = arith.constant dense<0.000000e+00> : vector<32x128xf32>
    %116 = tpu.matmul %115, %101, %cst_38 {dimension_numbers = #tpu.dot_dimension_numbers<[1], [0], [0], [1], [0, 0, 1, 1], [], []>} : vector<32x128xf32>, vector<128x128xf32>, vector<32x128xf32> -> vector<32x128xf32>
    %cst_39 = arith.constant dense<0.000000e+00> : vector<32x64xf32>
    %117 = tpu.matmul %116, %85, %cst_39 {dimension_numbers = #tpu.dot_dimension_numbers<[1], [0], [0], [1], [0, 0, 1, 1], [], []>} : vector<32x128xf32>, vector<128x64xf32>, vector<32x64xf32> -> vector<32x64xf32>
    %118 = vector.broadcast %89 : vector<1x64xf32> to vector<32x64xf32>
    %119 = arith.addf %117, %118 : vector<32x64xf32>
    %120 = arith.addf %83, %119 : vector<32x64xf32>
    %cst_40 = arith.constant dense<0.000000e+00> : vector<32x64xf32>
    %121 = tpu.matmul %120, %8, %cst_40 {dimension_numbers = #tpu.dot_dimension_numbers<[1], [0], [0], [1], [0, 0, 1, 1], [], []>} : vector<32x64xf32>, vector<64x64xf32>, vector<32x64xf32> -> vector<32x64xf32>
    %122 = arith.subf %120, %121 : vector<32x64xf32>
    %123 = arith.mulf %122, %122 : vector<32x64xf32>
    %cst_41 = arith.constant dense<0.000000e+00> : vector<32x64xf32>
    %124 = tpu.matmul %123, %8, %cst_41 {dimension_numbers = #tpu.dot_dimension_numbers<[1], [0], [0], [1], [0, 0, 1, 1], [], []>} : vector<32x64xf32>, vector<64x64xf32>, vector<32x64xf32> -> vector<32x64xf32>
    %cst_42 = arith.constant 9.99999974E-6 : f32
    %125 = vector.broadcast %cst_42 : f32 to vector<32x64xf32>
    %126 = arith.addf %124, %125 : vector<32x64xf32>
    %127 = math.rsqrt %126 : vector<32x64xf32>
    %128 = arith.mulf %122, %127 : vector<32x64xf32>
    %129 = vector.broadcast %92 : vector<1x64xf32> to vector<32x64xf32>
    %130 = arith.mulf %128, %129 : vector<32x64xf32>
    %131 = vector.broadcast %93 : vector<1x64xf32> to vector<32x64xf32>
    %132 = arith.addf %130, %131 : vector<32x64xf32>
    %cst_43 = arith.constant dense<0.000000e+00> : vector<32x64xf32>
    %133 = tpu.matmul %132, %86, %cst_43 {dimension_numbers = #tpu.dot_dimension_numbers<[1], [0], [0], [1], [0, 0, 1, 1], [], []>} : vector<32x64xf32>, vector<64x64xf32>, vector<32x64xf32> -> vector<32x64xf32>
    %134 = vector.broadcast %90 : vector<1x64xf32> to vector<32x64xf32>
    %135 = arith.addf %133, %134 : vector<32x64xf32>
    %cst_44 = arith.constant 0.000000e+00 : f32
    %136 = vector.broadcast %cst_44 : f32 to vector<32x64xf32>
    %137 = arith.maximumf %135, %136 : vector<32x64xf32>
    %cst_45 = arith.constant dense<0.000000e+00> : vector<32x64xf32>
    %138 = tpu.matmul %137, %87, %cst_45 {dimension_numbers = #tpu.dot_dimension_numbers<[1], [0], [0], [1], [0, 0, 1, 1], [], []>} : vector<32x64xf32>, vector<64x64xf32>, vector<32x64xf32> -> vector<32x64xf32>
    %139 = vector.broadcast %91 : vector<1x64xf32> to vector<32x64xf32>
    %140 = arith.addf %138, %139 : vector<32x64xf32>
    %141 = arith.addf %132, %140 : vector<32x64xf32>
    %cst_46 = arith.constant dense<0.000000e+00> : vector<32x64xf32>
    %142 = tpu.matmul %141, %8, %cst_46 {dimension_numbers = #tpu.dot_dimension_numbers<[1], [0], [0], [1], [0, 0, 1, 1], [], []>} : vector<32x64xf32>, vector<64x64xf32>, vector<32x64xf32> -> vector<32x64xf32>
    %143 = arith.subf %141, %142 : vector<32x64xf32>
    %144 = arith.mulf %143, %143 : vector<32x64xf32>
    %cst_47 = arith.constant dense<0.000000e+00> : vector<32x64xf32>
    %145 = tpu.matmul %144, %8, %cst_47 {dimension_numbers = #tpu.dot_dimension_numbers<[1], [0], [0], [1], [0, 0, 1, 1], [], []>} : vector<32x64xf32>, vector<64x64xf32>, vector<32x64xf32> -> vector<32x64xf32>
    %cst_48 = arith.constant 9.99999974E-6 : f32
    %146 = vector.broadcast %cst_48 : f32 to vector<32x64xf32>
    %147 = arith.addf %145, %146 : vector<32x64xf32>
    %148 = math.rsqrt %147 : vector<32x64xf32>
    %149 = arith.mulf %143, %148 : vector<32x64xf32>
    %150 = vector.broadcast %94 : vector<1x64xf32> to vector<32x64xf32>
    %151 = arith.mulf %149, %150 : vector<32x64xf32>
    %152 = vector.broadcast %95 : vector<1x64xf32> to vector<32x64xf32>
    %153 = arith.addf %151, %152 : vector<32x64xf32>
    %cst_49 = arith.constant 0.000000e+00 : f32
    %154 = vector.broadcast %cst_49 : f32 to vector<32x64xf32>
    %155 = arith.maximumf %153, %154 : vector<32x64xf32>
    %c0_50 = arith.constant 0 : index
    %c0_51 = arith.constant 0 : index
    %156 = vector.load %arg8[%c0_50, %c0_51] : memref<32x64xf32, #tpu.memory_space<vmem>>, vector<32x64xf32>
    tpu.vector_store %arg8[%c0_50, %c0_51], %155 {strides = array<i32>} : memref<32x64xf32, #tpu.memory_space<vmem>>, vector<32x64xf32>,
    return
  }
}

</mosaic_0001>

<bundles_post_ra>
// kernel: transformer_conv_forward.1
= control target key start
LH: loop header
LB: loop body
LE: loop exit
PB: predicated region body
PF: predicated region fallthrough
CT: control target
= control target key end

     0   :  { %v3778_v4 = vmov 0.0   ;;  %s5066_s0 = inlined_call_operand.vmem [shape: f32[32,64], index: 0, kind: input, shape index: {}]   ;;  %s5067_s1 = inlined_call_operand.vmem [shape: f32[32,64], index: 1, kind: input, shape index: {}]   ;;  %s5068_s2 = inlined_call_operand.vmem [shape: f32[32,128], index: 2, kind: input, shape index: {}]   ;;  %s5069_s3 = inlined_call_operand.vmem [shape: f32[128,128], index: 3, kind: input, shape index: {}]   ;;  %s5070_s4 = inlined_call_operand.vmem [shape: f32[128,128], index: 4, kind: input, shape index: {}]   ;;  %s5071_s5 = inlined_call_operand.vmem [shape: f32[64,512], index: 5, kind: input, shape index: {}]   ;;  %s5072_s6 = inlined_call_operand.vmem [shape: f32[576,64], index: 6, kind: input, shape index: {}]   ;;  %s5073_s7 = inlined_call_operand.vmem [shape: f32[17,256], index: 7, kind: input, shape index: {}]   ;;  %s5074_s8 = inlined_call_operand.hbm [shape: f32[32,64], index: 8, kind: output, shape index: {}]  }
   0x1   :  { %v103_v0 = vld [vmem:[%s5071_s5 + $0xe8] sm:$0xff]  ;;  %v102_v1 = vld [vmem:[%s5071_s5 + $0xe0] sm:$0xff]  ;;  %267 = vmatprep.mubr.f32.mxu0 %v3778_v4  ;;  %v104_v10 = vld [vmem:[%s5071_s5 + $0xf0] sm:$0xff] }
   0x2   :  { %v99_v2 = vld [vmem:[%s5071_s5 + $0xc8] sm:$0xff]  ;;  %219 = vmatprep.subr.mxu0 %v103_v0  ;;  %v98_v3 = vld [vmem:[%s5071_s5 + $0xc0] sm:$0xff]  ;;  %3031 = vmatprep.subr.mxu1 %v104_v10  ;;  %v100_v12 = vld [vmem:[%s5071_s5 + $0xd0] sm:$0xff] }
   0x3   :  { %220 = vmatpush1.msra.mxu0 %v102_v1  ;;  %v95_v5 = vld [vmem:[%s5071_s5 + $0xa8] sm:$0xff]  ;;  %v94_v6 = vld [vmem:[%s5071_s5 + $0xa0] sm:$0xff]  ;;  %3032 = vmatpush3.msra.mxu1 %v104_v10  ;;  %v96_v14 = vld [vmem:[%s5071_s5 + $0xb0] sm:$0xff] }
   0x4   :  { %221 = vmatprep.subr.mxu0 %v99_v2  ;;  %v91_v7 = vld [vmem:[%s5071_s5 + $0x88] sm:$0xff]  ;;  %v90_v8 = vld [vmem:[%s5071_s5 + $0x80] sm:$0xff]  ;;  %3033 = vmatprep.subr.mxu1 %v100_v12  ;;  %v92_v17 = vld [vmem:[%s5071_s5 + $0x90] sm:$0xff] }
   0x5   :  { %222 = vmatpush1.msra.mxu0 %v98_v3  ;;  %v87_v9 = vld [vmem:[%s5071_s5 + $0x68] sm:$0xff]  ;;  %v86_v11 = vld [vmem:[%s5071_s5 + $0x60] sm:$0xff]  ;;  %3034 = vmatpush3.msra.mxu1 %v100_v12  ;;  %v88_v20 = vld [vmem:[%s5071_s5 + $0x70] sm:$0xff] }
   0x6   :  { %223 = vmatprep.subr.mxu0 %v95_v5  ;;  %v83_v13 = vld [vmem:[%s5071_s5 + $0x48] sm:$0xff]  ;;  %v82_v15 = vld [vmem:[%s5071_s5 + $0x40] sm:$0xff]  ;;  %3035 = vmatprep.subr.mxu1 %v96_v14 }
   0x7   :  { %224 = vmatpush1.msra.mxu0 %v94_v6  ;;  %v79_v16 = vld [vmem:[%s5071_s5 + $0x28] sm:$0xff]  ;;  %v78_v18 = vld [vmem:[%s5071_s5 + $0x20] sm:$0xff]  ;;  %3036 = vmatpush3.msra.mxu1 %v96_v14 }
   0x8   :  { %225 = vmatprep.subr.mxu0 %v91_v7  ;;  %v75_v19 = vld [vmem:[%s5071_s5 + $0x8] sm:$0xff]  ;;  %v74_v21 = vld [vmem:[%s5071_s5] sm:$0xff]  ;;  %3037 = vmatprep.subr.mxu1 %v92_v17 }
   0x9   :  { %226 = vmatpush1.msra.mxu0 %v90_v8 }
   0xa   :  { %227 = vmatprep.subr.mxu0 %v87_v9 }
   0xb   :  { %228 = vmatpush1.msra.mxu0 %v86_v11 }
   0xc   :  { %229 = vmatprep.subr.mxu0 %v83_v13 }
   0xd   :  { %230 = vmatpush1.msra.mxu0 %v82_v15 }
   0xe   :  { %231 = vmatprep.subr.mxu0 %v79_v16 }
   0xf   :  { %13 = vsyncpa [#allocation3], 0  ;;  %232 = vmatpush1.msra.mxu0 %v78_v18  ;;  %v34_v22 = vld [vmem:[%s5067_s1] sm:$0xff]  ;;  %vm190_vm0 = vcmask 523264   ;;  %3038 = vmatpush3.msra.mxu1 %v92_v17  ;;  %v84_v23 = vld [vmem:[%s5071_s5 + $0x50] sm:$0xff]  ;;  %v182_v49 = vlaneseq  ;;  %s3779_s13 = smov [#allocation2]  }
  0x10   :  { %233 = vmatprep.subr.mxu0 %v75_v19  ;;  %3039 = vmatprep.subr.mxu1 %v88_v20  ;;  %v80_v24 = vld [vmem:[%s5071_s5 + $0x30] sm:$0xff]  ;;  %v3903_v25 = vld [vmem:[%s5066_s0] sm:$0xff]  ;;  %v35_v26 = vld [vmem:[%s5067_s1 + $0x8] sm:$0xff]  ;;  %s2631_s14 = sshll.u32 %s3779_s13, 4  ;;  %s2632_s14 = int_to_ptr.vmem [resolvable:$true] %s2631_s14 }
  0x11   :  { %234 = vmatpush1.msra.mxu0 %v74_v21  ;;  %3040 = vmatpush3.msra.mxu1 %v88_v20  ;;  %v76_v27 = vld [vmem:[%s5071_s5 + $0x10] sm:$0xff]  ;;  %v3918_v28 = vld [vmem:[%s5066_s0 + $0x8] sm:$0xff]  ;;  %v73_v29 = vld [vmem:[%s5070_s4 + $0x78] sm:$0xff]  ;;  %v3995_v50 = vshrl.u32 %v182_v49, 7  ;;  %p3761_p1 = scmp.lt.s32.totalorder %s2632_s14, %s2632_s14 }
  0x12   :  { %2642 = vmatmul.mubr.msk.f32.vlgmr.msra.gmra.mxu0 %vm190_vm0, %v34_v22  ;;  %3041 = vmatprep.subr.mxu1 %v84_v23  ;;  %v3927_v30 = vld [vmem:[%s5066_s0 + $0x10] sm:$0xff]  ;;  %v3943_v33 = vld [vmem:[%s5066_s0 + $0x18] sm:$0xff]  ;;  %v71_v34 = vld [vmem:[%s5070_s4 + $0x68] sm:$0xff] }
  0x13   :  { %273 = vmatprep.mubr.f32.mxu0 %v3778_v4  ;;  %3042 = vmatpush3.msra.mxu1 %v84_v23  ;;  %v36_v31 = vld [vmem:[%s5067_s1 + $0x10] sm:$0xff]  ;;  %v37_v35 = vld [vmem:[%s5067_s1 + $0x18] sm:$0xff]  ;;  %v70_v36 = vld [vmem:[%s5070_s4 + $0x60] sm:$0xff]  ;;  %v4001_v52 = vsub.s32 0, %v3995_v50  ;;  %v294_v55 = vsub.s32 1, %v3995_v50 }
  0x14   :  { %3043 = vmatprep.subr.mxu1 %v80_v24  ;;  %3047 = vmatprep.mubr.msk.f32.mxu1 %vm190_vm0, %v3903_v25  ;;  %v72_v32 = vld [vmem:[%s5070_s4 + $0x70] sm:$0xff]  ;;  %v69_v37 = vld [vmem:[%s5070_s4 + $0x58] sm:$0xff]  ;;  %v67_v39 = vld [vmem:[%s5070_s4 + $0x48] sm:$0xff] }
  0x15   :  { %3044 = vmatpush3.msra.mxu1 %v80_v24  ;;  %v68_v38 = vld [vmem:[%s5070_s4 + $0x50] sm:$0xff]  ;;  %v66_v40 = vld [vmem:[%s5070_s4 + $0x40] sm:$0xff]  ;;  %v65_v41 = vld [vmem:[%s5070_s4 + $0x38] sm:$0xff] }
  0x16   :  { %2643 = vmatmul.mubr.msk.f32.gmra.mxu0 %vm190_vm0, %v35_v26  ;;  %3045 = vmatprep.subr.mxu1 %v76_v27  ;;  %v64_v42 = vld [vmem:[%s5070_s4 + $0x30] sm:$0xff]  ;;  %v63_v43 = vld [vmem:[%s5070_s4 + $0x28] sm:$0xff]  ;;  %v62_v44 = vld [vmem:[%s5070_s4 + $0x20] sm:$0xff] }
  0x17   :  { %279 = vmatprep.mubr.f32.mxu0 %v3778_v4  ;;  %3046 = vmatpush3.msra.mxu1 %v76_v27  ;;  %v61_v45 = vld [vmem:[%s5070_s4 + $0x18] sm:$0xff]  ;;  %v60_v46 = vld [vmem:[%s5070_s4 + $0x10] sm:$0xff]  ;;  %v59_v47 = vld [vmem:[%s5070_s4 + $0x8] sm:$0xff] }
  0x18   :  { %3048 = vmatmul.mubr.msk.f32.vlgmr.msra.gmra.mxu1 %vm190_vm0, %v3918_v28  ;;  %3091 = vmatprep.subr.mxu1 %v73_v29  ;;  %v58_v48 = vld [vmem:[%s5070_s4] sm:$0xff]  ;;  %v179_v51 = vld [vmem:[%s5073_s7 + $0x8] sm:$0xff]  ;;  %v4079_v24 = vld [vmem:[%s5069_s3 + $0x78] sm:$0xff] }
  0x19   :  { %3050 = vmatprep.mubr.msk.f32.mxu1 %vm190_vm0, %v3927_v30  ;;  %3092 = vmatpush3.msra.mxu1 %v73_v29  ;;  %v189_v53 = vrot.slane %v179_v51, %v4001_v52  ;;  %v4008_v57 = vld [vmem:[%s5073_s7] sm:$0xff]  ;;  %v55_v9 = vld [vmem:[%s5069_s3 + $0x68] sm:$0xff]  ;;  %v56_v26 = vld [vmem:[%s5069_s3 + $0x70] sm:$0xff] }
  0x1a   :  { %2644 = vmatmul.mubr.msk.f32.gmra.mxu0 %vm190_vm0, %v36_v31  ;;  %3093 = vmatprep.subr.mxu1 %v72_v32  ;;  %v54_v60 = vld [vmem:[%s5069_s3 + $0x60] sm:$0xff]  ;;  %v4026_v63 = vrot.slane %v4008_v57, %v294_v55  ;;  %v51_v10 = vld [vmem:[%s5069_s3 + $0x48] sm:$0xff]  ;;  %v185_v21 = vrot.slane %v4008_v57, %v4001_v52  ;;  %v52_v27 = vld [vmem:[%s5069_s3 + $0x50] sm:$0xff] }
  0x1b   :  { %285 = vmatprep.mubr.f32.mxu0 %v3778_v4  ;;  %3094 = vmatpush3.msra.mxu1 %v72_v32  ;;  %v4016_v61 = vld [vmem:[%s5069_s3 + $0x40] sm:$0xff]  ;;  %v4056_v13 = vld [vmem:[%s5069_s3 + $0x28] sm:$0xff]  ;;  %v48_v32 = vld [vmem:[%s5069_s3 + $0x30] sm:$0xff] }
  0x1c   :  { %3051 = vmatmul.mubr.msk.f32.gmra.mxu1 %vm190_vm0, %v3943_v33  ;;  %3095 = vmatprep.subr.mxu1 %v71_v34  ;;  %v4021_v62 = vld [vmem:[%s5069_s3 + $0x20] sm:$0xff]  ;;  %v4061_v14 = vld [vmem:[%s5069_s3 + $0x8] sm:$0xff] }
  0x1d   :  { %3096 = vmatpush3.msra.mxu1 %v71_v34  ;;  %v4031_v0 = vld [vmem:[%s5069_s3] sm:$0xff]  ;;  %v44_v34 = vld [vmem:[%s5069_s3 + $0x10] sm:$0xff] }
  0x1e   :  { %2645 = vmatmul.mubr.msk.f32.gmra.mxu0 %vm190_vm0, %v37_v35  ;;  %3097 = vmatprep.subr.mxu1 %v70_v36 }
  0x1f   :  { %3098 = vmatpush3.msra.mxu1 %v70_v36 }
  0x20   :  { %3099 = vmatprep.subr.mxu1 %v69_v37 }
  0x21   :  { %3100 = vmatpush3.msra.mxu1 %v69_v37 }
  0x22   :  { %3101 = vmatprep.subr.mxu1 %v68_v38 }
  0x23   :  { %3102 = vmatpush3.msra.mxu1 %v68_v38 }
  0x24   :  { %3103 = vmatprep.subr.mxu1 %v67_v39 }
  0x25   :  { %3104 = vmatpush3.msra.mxu1 %v67_v39 }
  0x26   :  { %3105 = vmatprep.subr.mxu1 %v66_v40 }
  0x27   :  { %3106 = vmatpush3.msra.mxu1 %v66_v40 }
  0x28   :  { %3107 = vmatprep.subr.mxu1 %v65_v41 }
  0x29   :  { %3108 = vmatpush3.msra.mxu1 %v65_v41 }
  0x2a   :  { %3109 = vmatprep.subr.mxu1 %v64_v42 }
  0x2b   :  { %3110 = vmatpush3.msra.mxu1 %v64_v42 }
  0x2c   :  { %3111 = vmatprep.subr.mxu1 %v63_v43 }
  0x2d   :  { %3112 = vmatpush3.msra.mxu1 %v63_v43  ;;  %v53_v43 = vld [vmem:[%s5069_s3 + $0x58] sm:$0xff] }
  0x2e   :  { %3113 = vmatprep.subr.mxu1 %v62_v44 }
  0x2f   :  { %3114 = vmatpush3.msra.mxu1 %v62_v44  ;;  %v49_v44 = vld [vmem:[%s5069_s3 + $0x38] sm:$0xff] }
  0x30   :  { %3115 = vmatprep.subr.mxu1 %v61_v45 }
  0x31   :  { %3116 = vmatpush3.msra.mxu1 %v61_v45 }
  0x32   :  { %3117 = vmatprep.subr.mxu1 %v60_v46 }
  0x33   :  { %3118 = vmatpush3.msra.mxu1 %v60_v46  ;;  %v45_v46 = vld [vmem:[%s5069_s3 + $0x18] sm:$0xff] }
  0x34   :  { %3119 = vmatprep.subr.mxu1 %v59_v47 }
  0x35   :  { %3120 = vmatpush3.msra.mxu1 %v59_v47 }
  0x36   :  { %3121 = vmatprep.subr.mxu1 %v58_v48 }
  0x37   :  { %3122 = vmatpush3.msra.mxu1 %v58_v48 }
  0xd2   :  { %v269_v54 = vpop.f32.mrf.mxu0 }
  0xd3   :  { %v270_v51 = vadd.f32 %v269_v54, %v185_v21 }
  0xd4   :  { %v271_v56 = vpop.f32.mrf.mxu0 }
  0xd5   :  { %v272_v58 = vadd.f32 %v271_v56, %v189_v53  ;;  %v4134_v56 = vmul.f32 %v270_v51, %v54_v60 }
  0xd6   :  { %v275_v59 = vpop.f32.mrf.mxu0 }
  0xd7   :  { %v4033_v1 = vmul.f32 %v272_v58, %v54_v60  ;;  %v4036_v2 = vmul.f32 %v272_v58, %v4016_v61  ;;  %v4039_v3 = vmul.f32 %v272_v58, %v4021_v62  ;;  %v4042_v6 = vmul.f32 %v272_v58, %v4031_v0 }
  0xd8   :  { %v277_v4 = vpop.f32.mrf.mxu0  ;;  %v3049_v5 = vpop.f32.mrf.mxu1  ;;  %v276_v42 = vadd.f32 %v275_v59, %v185_v21  ;;  %v4151_v60 = vmul.f32 %v270_v51, %v4016_v61  ;;  %v4169_v61 = vmul.f32 %v270_v51, %v4021_v62 }
  0xd9   :  { %v278_v7 = vadd.f32 %v277_v4, %v189_v53  ;;  %v4051_v11 = vadd.f32 %v3049_v5, %v4026_v63 }
  0xda   :  { %v281_v8 = vpop.f32.mrf.mxu0  ;;  %v374_v12 = vpop.f32.mrf.mxu1  ;;  %v4146_v54 = vmul.f32 %v276_v42, %v51_v10 }
  0xdb   :  { %v375_v15 = vadd.f32 %v374_v12, %v4026_v63  ;;  %v4064_v16 = vmul.f32 %v278_v7, %v55_v9  ;;  %v4066_v17 = vmul.f32 %v278_v7, %v51_v10  ;;  %v4069_v19 = vmul.f32 %v278_v7, %v4056_v13 }
  0xdc   :  { %v283_v18 = vpop.f32.mrf.mxu0  ;;  %v4072_v20 = vmul.f32 %v278_v7, %v4061_v14  ;;  %v282_v29 = vadd.f32 %v281_v8, %v185_v21  ;;  %v4164_v7 = vmul.f32 %v276_v42, %v4056_v13  ;;  %v4182_v10 = vmul.f32 %v276_v42, %v4061_v14  ;;  %v3052_v62 = vpop.f32.mrf.mxu1 }
  0xdd   :  { %v284_v22 = vadd.f32 %v283_v18, %v189_v53  ;;  %3085 = vmatprep.mubr.f32.mxu0 %v375_v15  ;;  %v4187_v12 = vmul.f32 %v270_v51, %v4031_v0  ;;  %v390_v14 = vadd.f32 %v3052_v62, %v4026_v63  ;;  %v38_v0 = vld [vmem:[%s5068_s2] sm:$0xff] }
  0xde   :  { %v287_v23 = vpop.f32.mrf.mxu0  ;;  %v4114_v45 = vmul.f32 %v282_v29, %v56_v26  ;;  %v4142_v59 = vmul.f32 %v282_v29, %v52_v27  ;;  %v4159_v5 = vmul.f32 %v282_v29, %v48_v32  ;;  %v384_v13 = vpop.f32.mrf.mxu1 }
  0xdf   :  { %v288_v31 = vadd.f32 %v287_v23, %v185_v21  ;;  %v4093_v35 = vmul.f32 %v284_v22, %v56_v26  ;;  %v4095_v36 = vmul.f32 %v284_v22, %v52_v27  ;;  %v4097_v38 = vmul.f32 %v284_v22, %v48_v32 }
  0xe0   :  { %v289_v37 = vpop.f32.mrf.mxu0  ;;  %v4099_v39 = vmul.f32 %v284_v22, %v44_v34  ;;  %v385_v15 = vadd.f32 %v384_v13, %v4026_v63  ;;  %v40_v63 = vld [vmem:[%s5068_s2 + $0x10] sm:$0xff] }
  0xe1   :  { %v4101_v40 = vadd.f32 %v289_v37, %v189_v53  ;;  %v4104_v41 = vmul.f32 %v288_v31, %v4079_v24  ;;  %v4130_v53 = vmul.f32 %v276_v42, %v55_v9  ;;  %v4138_v58 = vmul.f32 %v288_v31, %v53_v43  ;;  %v41_v42 = vld [vmem:[%s5068_s2 + $0x18] sm:$0xff] }
  0xe2   :  { %v4155_v4 = vmul.f32 %v288_v31, %v49_v44  ;;  %v4173_v8 = vmul.f32 %v288_v31, %v45_v46  ;;  %v4177_v9 = vmul.f32 %v282_v29, %v44_v34  ;;  %v39_v31 = vld [vmem:[%s5068_s2 + $0x8] sm:$0xff] }
  0xe3   :  { %3053 = vmatprep.subr.mxu0 %v4104_v41  ;;  %3129 = vmatprep.subr.mxu1 %v4104_v41  ;;  %v4120_v47 = vmul.f32 %v4101_v40, %v53_v43  ;;  %v4123_v48 = vmul.f32 %v4101_v40, %v49_v44  ;;  %v4127_v49 = vmul.f32 %v4101_v40, %v45_v46 }
  0xe4   :  { %3054 = vmatpush3.xpose.msra.mxu0 %v4104_v41 }
  0xe5   :  { %3055 = vmatprep.subr.mxu0 %v4114_v45 }
  0xe8   :  { %3056 = vmatpush3.xpose.msra.mxu0 %v4114_v45 }
  0xe9   :  { %3057 = vmatprep.subr.mxu0 %v4130_v53 }
  0xec   :  { %3058 = vmatpush3.xpose.msra.mxu0 %v4130_v53 }
  0xed   :  { %3059 = vmatprep.subr.mxu0 %v4134_v56 }
  0xf0   :  { %3060 = vmatpush3.xpose.msra.mxu0 %v4134_v56 }
  0xf1   :  { %3061 = vmatprep.subr.mxu0 %v4138_v58 }
  0xf4   :  { %3062 = vmatpush3.xpose.msra.mxu0 %v4138_v58 }
  0xf5   :  { %3063 = vmatprep.subr.mxu0 %v4142_v59 }
  0xf8   :  { %3064 = vmatpush3.xpose.msra.mxu0 %v4142_v59 }
  0xf9   :  { %3065 = vmatprep.subr.mxu0 %v4146_v54 }
  0xfc   :  { %3066 = vmatpush3.xpose.msra.mxu0 %v4146_v54 }
  0xfd   :  { %3067 = vmatprep.subr.mxu0 %v4151_v60 }
 0x100   :  { %3068 = vmatpush3.xpose.msra.mxu0 %v4151_v60 }
 0x101   :  { %3069 = vmatprep.subr.mxu0 %v4155_v4 }
 0x104   :  { %3070 = vmatpush3.xpose.msra.mxu0 %v4155_v4 }
 0x105   :  { %3071 = vmatprep.subr.mxu0 %v4159_v5 }
 0x108   :  { %3072 = vmatpush3.xpose.msra.mxu0 %v4159_v5 }
 0x109   :  { %3073 = vmatprep.subr.mxu0 %v4164_v7 }
 0x10c   :  { %3074 = vmatpush3.xpose.msra.mxu0 %v4164_v7 }
 0x10d   :  { %3075 = vmatprep.subr.mxu0 %v4169_v61 }
 0x110   :  { %3076 = vmatpush3.xpose.msra.mxu0 %v4169_v61 }
 0x111   :  { %3077 = vmatprep.subr.mxu0 %v4173_v8 }
 0x114   :  { %3078 = vmatpush3.xpose.msra.mxu0 %v4173_v8 }
 0x115   :  { %3079 = vmatprep.subr.mxu0 %v4177_v9 }
 0x118   :  { %3080 = vmatpush3.xpose.msra.mxu0 %v4177_v9 }
 0x119   :  { %3081 = vmatprep.subr.mxu0 %v4182_v10 }
 0x11c   :  { %3082 = vmatpush3.xpose.msra.mxu0 %v4182_v10 }
 0x11d   :  { %3083 = vmatprep.subr.mxu0 %v4187_v12 }
 0x120   :  { %3084 = vmatpush3.xpose.msra.mxu0 %v4187_v12 }
 0x123   :  { %3086 = vmatmul.mubr.f32.vlgmr.msra.gmra.mxu0 %v4051_v11 }
 0x124   :  { %3088 = vmatprep.mubr.f32.mxu0 %v385_v15 }
 0x127   :  { %3089 = vmatmul.mubr.f32.gmra.mxu0 %v390_v14 }
 0x1e3   :  { %v3087_v18 = vpop.f32.mrf.mxu0 }
 0x1e4   :  { %v495_v26 = vmul.f32 0.25, %v3087_v18 }
 0x1e5   :  { %v475_v21 = vpop.f32.mrf.mxu0 }
 0x1e6   :  { %v494_v22 = vmul.f32 0.25, %v475_v21  ;;  %v499_v34 = vadd.f32 %v495_v26, %v39_v31 }
 0x1e7   :  { %v3090_v23 = vpop.f32.mrf.mxu0 }
 0x1e8   :  { %v498_v27 = vadd.f32 %v494_v22, %v38_v0  ;;  %v497_v32 = vmul.f32 0.25, %v3090_v23 }
 0x1e9   :  { %v485_v29 = vpop.f32.mrf.mxu0 }
 0x1ea   :  { %v496_v11 = vmul.f32 0.25, %v485_v29  ;;  %502 = vmax.xlane.f32.xlu0 %v498_v27  ;;  %v501_v43 = vadd.f32 %v497_v32, %v41_v42 }
 0x1ec   :  { %v500_v37 = vadd.f32 %v496_v11, %v40_v63 }
 0x1ee   :  { %504 = vmax.xlane.f32.xlu0 %v499_v34  ;;  %506 = vmax.xlane.f32.xlu1 %v500_v37 }
 0x1f2   :  { %508 = vmax.xlane.f32.xlu1 %v501_v43 }
 0x273   :  { %v503_v44 = vpop.xlane.xlu0 %502 }
 0x274   :  { %v510_v46 = vsub.f32 %v498_v27, %v503_v44 }
 0x276   :  { %v514_v51 = vmul.f32 1.442695, %v510_v46 }
 0x277   :  { %v505_v62 = vpop.xlane.xlu0 %504  ;;  %v507_v13 = vpop.xlane.xlu1 %506 }
 0x278   :  { %3663 = vpow2.f32 %v514_v51  ;;  %v511_v15 = vsub.f32 %v499_v34, %v505_v62  ;;  %v512_v14 = vsub.f32 %v500_v37, %v507_v13 }
 0x27a   :  { %v516_v18 = vmul.f32 1.442695, %v511_v15  ;;  %v518_v21 = vmul.f32 1.442695, %v512_v14 }
 0x27b   :  { %v509_v0 = vpop.xlane.xlu1 %508 }
 0x27c   :  { %3665 = vpow2.f32 %v516_v18  ;;  %v513_v22 = vsub.f32 %v501_v43, %v509_v0  ;;  %v107_v18 = vld [vmem:[%s5072_s6 + $0x8] sm:$0xff]  ;;  %v4305_v0 = vld [vmem:[%s5072_s6 + $0x238] sm:$0xff] }
 0x27d   :  { %3667 = vpow2.f32 %v518_v21  ;;  %v106_v21 = vld [vmem:[%s5072_s6] sm:$0xff] }
 0x27e   :  { %v520_v23 = vmul.f32 1.442695, %v513_v22  ;;  %v4310_v22 = vld [vmem:[%s5072_s6 + $0x230] sm:$0xff] }
 0x280   :  { %3669 = vpow2.f32 %v520_v23  ;;  %v4317_v23 = vld [vmem:[%s5072_s6 + $0x228] sm:$0xff] }
 0x285   :  { %v4207_v26 = vpop.eup %3663 }
 0x286   :  { %3123 = vmatprep.mubr.f32.mxu1 %v4207_v26 }
 0x289   :  { %v4210_v29 = vpop.eup %3665 }
 0x28a   :  { %v4212_v27 = vpop.eup %3667  ;;  %3124 = vmatmul.mubr.f32.vlgmr.msra.gmra.mxu1 %v4210_v29 }
 0x28b   :  { %3130 = vmatpush3.msra.mxu1 %v4104_v41  ;;  %3126 = vmatprep.mubr.f32.mxu1 %v4212_v27  ;;  %v121_v41 = vld [vmem:[%s5072_s6 + $0x78] sm:$0xff] }
 0x28c   :  { %3131 = vmatprep.subr.mxu1 %v4114_v45  ;;  %3167 = vmatprep.subr.mxu0 %v121_v41 }
 0x28d   :  { %v4218_v31 = vpop.eup %3669  ;;  %3132 = vmatpush3.msra.mxu1 %v4114_v45  ;;  %v120_v45 = vld [vmem:[%s5072_s6 + $0x70] sm:$0xff]  ;;  %3168 = vmatpush3.msra.mxu0 %v121_v41 }
 0x28e   :  { %3133 = vmatprep.subr.mxu1 %v4130_v53  ;;  %3127 = vmatmul.mubr.f32.gmra.mxu1 %v4218_v31 }
 0x28f   :  { %3134 = vmatpush3.msra.mxu1 %v4130_v53  ;;  %v119_v53 = vld [vmem:[%s5072_s6 + $0x68] sm:$0xff]  ;;  %3169 = vmatprep.subr.mxu0 %v120_v45 }
 0x290   :  { %3135 = vmatprep.subr.mxu1 %v4134_v56  ;;  %3170 = vmatpush3.msra.mxu0 %v120_v45  ;;  %v4333_v45 = vld [vmem:[%s5072_s6 + $0x218] sm:$0xff] }
 0x291   :  { %3136 = vmatpush3.msra.mxu1 %v4134_v56  ;;  %v118_v56 = vld [vmem:[%s5072_s6 + $0x60] sm:$0xff]  ;;  %3171 = vmatprep.subr.mxu0 %v119_v53 }
 0x292   :  { %3137 = vmatprep.subr.mxu1 %v4138_v58  ;;  %3172 = vmatpush3.msra.mxu0 %v119_v53  ;;  %v4340_v53 = vld [vmem:[%s5072_s6 + $0x210] sm:$0xff] }
 0x293   :  { %3138 = vmatpush3.msra.mxu1 %v4138_v58  ;;  %v117_v58 = vld [vmem:[%s5072_s6 + $0x58] sm:$0xff]  ;;  %3173 = vmatprep.subr.mxu0 %v118_v56 }
 0x294   :  { %3139 = vmatprep.subr.mxu1 %v4142_v59  ;;  %3174 = vmatpush3.msra.mxu0 %v118_v56  ;;  %v4347_v56 = vld [vmem:[%s5072_s6 + $0x208] sm:$0xff] }
 0x295   :  { %3140 = vmatpush3.msra.mxu1 %v4142_v59  ;;  %v116_v59 = vld [vmem:[%s5072_s6 + $0x50] sm:$0xff]  ;;  %3175 = vmatprep.subr.mxu0 %v117_v58 }
 0x296   :  { %3141 = vmatprep.subr.mxu1 %v4146_v54  ;;  %3176 = vmatpush3.msra.mxu0 %v117_v58  ;;  %v4354_v58 = vld [vmem:[%s5072_s6 + $0x200] sm:$0xff] }
 0x297   :  { %3142 = vmatpush3.msra.mxu1 %v4146_v54  ;;  %v115_v54 = vld [vmem:[%s5072_s6 + $0x48] sm:$0xff]  ;;  %3177 = vmatprep.subr.mxu0 %v116_v59 }
 0x298   :  { %3143 = vmatprep.subr.mxu1 %v4151_v60  ;;  %3178 = vmatpush3.msra.mxu0 %v116_v59  ;;  %v702_v59 = vsub.s32 2, %v3995_v50 }
 0x299   :  { %3144 = vmatpush3.msra.mxu1 %v4151_v60  ;;  %v114_v60 = vld [vmem:[%s5072_s6 + $0x40] sm:$0xff]  ;;  %3179 = vmatprep.subr.mxu0 %v115_v54 }
 0x29a   :  { %3145 = vmatprep.subr.mxu1 %v4155_v4  ;;  %3180 = vmatpush3.msra.mxu0 %v115_v54  ;;  %v703_v54 = vrot.slane %v4008_v57, %v702_v59 }
 0x29b   :  { %3146 = vmatpush3.msra.mxu1 %v4155_v4  ;;  %v113_v4 = vld [vmem:[%s5072_s6 + $0x38] sm:$0xff]  ;;  %3181 = vmatprep.subr.mxu0 %v114_v60 }
 0x29c   :  { %3147 = vmatprep.subr.mxu1 %v4159_v5  ;;  %3182 = vmatpush3.msra.mxu0 %v114_v60 }
 0x29d   :  { %3148 = vmatpush3.msra.mxu1 %v4159_v5  ;;  %v112_v5 = vld [vmem:[%s5072_s6 + $0x30] sm:$0xff]  ;;  %3183 = vmatprep.subr.mxu0 %v113_v4 }
 0x29e   :  { %3149 = vmatprep.subr.mxu1 %v4164_v7  ;;  %3184 = vmatpush3.msra.mxu0 %v113_v4 }
 0x29f   :  { %3150 = vmatpush3.msra.mxu1 %v4164_v7  ;;  %v111_v7 = vld [vmem:[%s5072_s6 + $0x28] sm:$0xff]  ;;  %3185 = vmatprep.subr.mxu0 %v112_v5 }
 0x2a0   :  { %3151 = vmatprep.subr.mxu1 %v4169_v61  ;;  %3186 = vmatpush3.msra.mxu0 %v112_v5 }
 0x2a1   :  { %3152 = vmatpush3.msra.mxu1 %v4169_v61  ;;  %v110_v61 = vld [vmem:[%s5072_s6 + $0x20] sm:$0xff]  ;;  %3187 = vmatprep.subr.mxu0 %v111_v7 }
 0x2a2   :  { %3153 = vmatprep.subr.mxu1 %v4173_v8  ;;  %3188 = vmatpush3.msra.mxu0 %v111_v7 }
 0x2a3   :  { %3154 = vmatpush3.msra.mxu1 %v4173_v8  ;;  %v109_v8 = vld [vmem:[%s5072_s6 + $0x18] sm:$0xff]  ;;  %3189 = vmatprep.subr.mxu0 %v110_v61 }
 0x2a4   :  { %3155 = vmatprep.subr.mxu1 %v4177_v9  ;;  %3190 = vmatpush3.msra.mxu0 %v110_v61 }
 0x2a5   :  { %3156 = vmatpush3.msra.mxu1 %v4177_v9  ;;  %v108_v9 = vld [vmem:[%s5072_s6 + $0x10] sm:$0xff]  ;;  %3191 = vmatprep.subr.mxu0 %v109_v8 }
 0x2a6   :  { %3157 = vmatprep.subr.mxu1 %v4182_v10  ;;  %3192 = vmatpush3.msra.mxu0 %v109_v8 }
 0x2a7   :  { %3158 = vmatpush3.msra.mxu1 %v4182_v10  ;;  %3193 = vmatprep.subr.mxu0 %v108_v9 }
 0x2a8   :  { %3159 = vmatprep.subr.mxu1 %v4187_v12  ;;  %3194 = vmatpush3.msra.mxu0 %v108_v9 }
 0x2a9   :  { %3160 = vmatpush3.msra.mxu1 %v4187_v12  ;;  %3195 = vmatprep.subr.mxu0 %v107_v18 }
 0x2aa   :  { %3196 = vmatpush3.msra.mxu0 %v107_v18  ;;  %3205 = vmatprep.subr.mxu1 %v4305_v0  ;;  %v126_v18 = vld [vmem:[%s5072_s6 + $0xa0] sm:$0xff] }
 0x2ab   :  { %3197 = vmatprep.subr.mxu0 %v106_v21 }
 0x2ac   :  { %3198 = vmatpush3.msra.mxu0 %v106_v21  ;;  %v125_v21 = vld [vmem:[%s5072_s6 + $0x98] sm:$0xff] }
 0x34a   :  { %v3125_v10 = vpop.f32.mrf.mxu1 }
 0x34b   :  { %v594_v12 = vadd.f32 1e-12, %v3125_v10 }
 0x34c   :  { %v588_v63 = vpop.f32.mrf.mxu1 }
 0x34d   :  { %v589_v11 = vadd.f32 1e-12, %v588_v63  ;;  %3671 = vrcp.f32 %v594_v12 }
 0x34e   :  { %v3128_v32 = vpop.f32.mrf.mxu1 }
 0x34f   :  { %3673 = vrcp.f32 %v589_v11  ;;  %v604_v34 = vadd.f32 1e-12, %v3128_v32 }
 0x350   :  { %v598_v37 = vpop.f32.mrf.mxu1 }
 0x351   :  { %v599_v42 = vadd.f32 1e-12, %v598_v37  ;;  %3675 = vrcp.f32 %v604_v34 }
 0x353   :  { %3677 = vrcp.f32 %v599_v42 }
 0x35a   :  { %v3672_v43 = vpop.eup %3671 }
 0x35b   :  { %v612_v51 = vmul.f32 %v3672_v43, %v4210_v29 }
 0x35c   :  { %v3674_v44 = vpop.eup %3673 }
 0x35d   :  { %v611_v46 = vmul.f32 %v3674_v44, %v4207_v26  ;;  %v4324_v26 = vld [vmem:[%s5072_s6 + $0x220] sm:$0xff] }
 0x35e   :  { %v3676_v62 = vpop.eup %3675 }
 0x35f   :  { %3161 = vmatprep.mubr.f32.mxu1 %v611_v46  ;;  %v614_v14 = vmul.f32 %v3676_v62, %v4218_v31 }
 0x360   :  { %v3678_v13 = vpop.eup %3677  ;;  %3162 = vmatmul.mubr.f32.vlgmr.msra.gmra.mxu1 %v612_v51 }
 0x361   :  { %v613_v15 = vmul.f32 %v3678_v13, %v4212_v27  ;;  %3206 = vmatpush3.msra.mxu1 %v4305_v0  ;;  %v129_v13 = vld [vmem:[%s5072_s6 + $0xb8] sm:$0xff] }
 0x362   :  { %3207 = vmatprep.subr.mxu1 %v4310_v22  ;;  %3249 = vmatprep.subr.mxu0 %v129_v13 }
 0x363   :  { %3164 = vmatprep.mubr.f32.mxu1 %v613_v15  ;;  %3208 = vmatpush3.msra.mxu1 %v4310_v22  ;;  %v128_v15 = vld [vmem:[%s5072_s6 + $0xb0] sm:$0xff] }
 0x364   :  { %3165 = vmatmul.mubr.f32.gmra.mxu1 %v614_v14  ;;  %3209 = vmatprep.subr.mxu1 %v4317_v23  ;;  %v127_v14 = vld [vmem:[%s5072_s6 + $0xa8] sm:$0xff] }
 0x365   :  { %3210 = vmatpush3.msra.mxu1 %v4317_v23 }
 0x366   :  { %3211 = vmatprep.subr.mxu1 %v4324_v26 }
 0x367   :  { %3212 = vmatpush3.msra.mxu1 %v4324_v26 }
 0x368   :  { %3213 = vmatprep.subr.mxu1 %v4333_v45 }
 0x369   :  { %3214 = vmatpush3.msra.mxu1 %v4333_v45 }
 0x36a   :  { %3215 = vmatprep.subr.mxu1 %v4340_v53 }
 0x36b   :  { %3216 = vmatpush3.msra.mxu1 %v4340_v53 }
 0x36c   :  { %3217 = vmatprep.subr.mxu1 %v4347_v56 }
 0x36d   :  { %3218 = vmatpush3.msra.mxu1 %v4347_v56 }
 0x36e   :  { %3219 = vmatprep.subr.mxu1 %v4354_v58 }
 0x36f   :  { %3220 = vmatpush3.msra.mxu1 %v4354_v58 }
 0x370   :  { %3227 = vmatprep.subr.mxu1 %v4305_v0 }
 0x420   :  { %v3163_v29 = vpop.f32.mrf.mxu1 }
 0x422   :  { %v681_v27 = vpop.f32.mrf.mxu1 }
 0x423   :  { %3199 = vmatprep.mubr.f32.mxu0 %v681_v27  ;;  %v123_v27 = vld [vmem:[%s5072_s6 + $0x88] sm:$0xff] }
 0x424   :  { %v3166_v31 = vpop.f32.mrf.mxu1  ;;  %3200 = vmatmul.mubr.f32.vlgmr.msra.gmra.mxu0 %v3163_v29  ;;  %v124_v29 = vld [vmem:[%s5072_s6 + $0x90] sm:$0xff] }
 0x425   :  { %3250 = vmatpush3.msra.mxu0 %v129_v13 }
 0x426   :  { %v691_v41 = vpop.f32.mrf.mxu1  ;;  %3251 = vmatprep.subr.mxu0 %v128_v15 }
 0x427   :  { %3202 = vmatprep.mubr.f32.mxu0 %v691_v41  ;;  %3252 = vmatpush3.msra.mxu0 %v128_v15  ;;  %v137_v41 = vld [vmem:[%s5072_s6 + $0xf8] sm:$0xff] }
 0x428   :  { %3203 = vmatmul.mubr.f32.gmra.mxu0 %v3166_v31  ;;  %3253 = vmatprep.subr.mxu0 %v127_v14  ;;  %v122_v31 = vld [vmem:[%s5072_s6 + $0x80] sm:$0xff] }
 0x429   :  { %3254 = vmatpush3.msra.mxu0 %v127_v14 }
 0x42a   :  { %3255 = vmatprep.subr.mxu0 %v126_v18 }
 0x42b   :  { %3256 = vmatpush3.msra.mxu0 %v126_v18 }
 0x42c   :  { %3257 = vmatprep.subr.mxu0 %v125_v21 }
 0x42d   :  { %3258 = vmatpush3.msra.mxu0 %v125_v21 }
 0x42e   :  { %3259 = vmatprep.subr.mxu0 %v124_v29 }
 0x42f   :  { %3260 = vmatpush3.msra.mxu0 %v124_v29 }
 0x430   :  { %3261 = vmatprep.subr.mxu0 %v123_v27 }
 0x431   :  { %3262 = vmatpush3.msra.mxu0 %v123_v27 }
 0x432   :  { %3263 = vmatprep.subr.mxu0 %v122_v31 }
 0x433   :  { %3264 = vmatpush3.msra.mxu0 %v122_v31 }
 0x434   :  { %3293 = vmatprep.subr.mxu0 %v4305_v0 }
 0x4e4   :  { %v3201_v60 = vpop.f32.mrf.mxu0 }
 0x4e5   :  { %v776_v4 = vadd.f32 %v3201_v60, %v703_v54  ;;  %v135_v60 = vld [vmem:[%s5072_s6 + $0xe8] sm:$0xff] }
 0x4e6   :  { %v770_v5 = vpop.f32.mrf.mxu0 }
 0x4e7   :  { %v771_v7 = vadd.f32 %v770_v5, %v703_v54  ;;  %v790_v9 = vadd.f32 %v776_v4, %v3918_v28  ;;  %v134_v4 = vld [vmem:[%s5072_s6 + $0xe0] sm:$0xff]  ;;  %v133_v5 = vld [vmem:[%s5072_s6 + $0xd8] sm:$0xff] }
 0x4e8   :  { %v3204_v61 = vpop.f32.mrf.mxu0 }
 0x4e9   :  { %v789_v8 = vadd.f32 %v771_v7, %v3903_v25  ;;  %v786_v10 = vadd.f32 %v3204_v61, %v703_v54 }
 0x4ea   :  { %v780_v12 = vpop.f32.mrf.mxu0 }
 0x4eb   :  { %v781_v63 = vadd.f32 %v780_v12, %v703_v54  ;;  %3221 = vmatprep.mubr.msk.f32.mxu1 %vm190_vm0, %v789_v8  ;;  %v792_v32 = vadd.f32 %v786_v10, %v3943_v33  ;;  %v136_v54 = vld [vmem:[%s5072_s6 + $0xf0] sm:$0xff] }
 0x4ec   :  { %3222 = vmatmul.mubr.msk.f32.vlgmr.msra.gmra.mxu1 %vm190_vm0, %v790_v9 }
 0x4ed   :  { %v791_v11 = vadd.f32 %v781_v63, %v3927_v30  ;;  %3228 = vmatpush3.msra.mxu1 %v4305_v0 }
 0x4ee   :  { %3229 = vmatprep.subr.mxu1 %v4310_v22 }
 0x4ef   :  { %3224 = vmatprep.mubr.msk.f32.mxu1 %vm190_vm0, %v791_v11  ;;  %3230 = vmatpush3.msra.mxu1 %v4310_v22 }
 0x4f0   :  { %3225 = vmatmul.mubr.msk.f32.gmra.mxu1 %vm190_vm0, %v792_v32  ;;  %3231 = vmatprep.subr.mxu1 %v4317_v23 }
 0x4f1   :  { %3232 = vmatpush3.msra.mxu1 %v4317_v23 }
 0x4f2   :  { %3233 = vmatprep.subr.mxu1 %v4324_v26 }
 0x4f3   :  { %3234 = vmatpush3.msra.mxu1 %v4324_v26 }
 0x4f4   :  { %3235 = vmatprep.subr.mxu1 %v4333_v45 }
 0x4f5   :  { %3236 = vmatpush3.msra.mxu1 %v4333_v45 }
 0x4f6   :  { %3237 = vmatprep.subr.mxu1 %v4340_v53 }
 0x4f7   :  { %3238 = vmatpush3.msra.mxu1 %v4340_v53 }
 0x4f8   :  { %3239 = vmatprep.subr.mxu1 %v4347_v56 }
 0x4f9   :  { %3240 = vmatpush3.msra.mxu1 %v4347_v56 }
 0x4fa   :  { %3241 = vmatprep.subr.mxu1 %v4354_v58 }
 0x4fb   :  { %3242 = vmatpush3.msra.mxu1 %v4354_v58 }
 0x4fc   :  { %3271 = vmatprep.subr.mxu1 %v137_v41 }
 0x5ac   :  { %v3223_v25 = vpop.f32.mrf.mxu1 }
 0x5ad   :  { %v4386_v28 = vsub.f32 %v790_v9, %v3223_v25 }
 0x5ae   :  { %v871_v30 = vpop.f32.mrf.mxu1 }
 0x5af   :  { %v4388_v33 = vsub.f32 %v789_v8, %v871_v30  ;;  %v895_v42 = vmul.f32 %v4386_v28, %v4386_v28 }
 0x5b0   :  { %v3226_v34 = vpop.f32.mrf.mxu1 }
 0x5b1   :  { %v894_v37 = vmul.f32 %v4388_v33, %v4388_v33  ;;  %v4394_v43 = vsub.f32 %v792_v32, %v3226_v34  ;;  %v1005_v32 = vsub.s32 5, %v3995_v50  ;;  %v1013_v34 = vsub.s32 6, %v3995_v50 }
 0x5b2   :  { %v881_v44 = vpop.f32.mrf.mxu1 }
 0x5b3   :  { %v4396_v46 = vsub.f32 %v791_v11, %v881_v44  ;;  %3243 = vmatprep.mubr.msk.f32.mxu1 %vm190_vm0, %v894_v37  ;;  %v897_v62 = vmul.f32 %v4394_v43, %v4394_v43  ;;  %v1006_v30 = vrot.slane %v4008_v57, %v1005_v32  ;;  %v1014_v13 = vrot.slane %v4008_v57, %v1013_v34 }
 0x5b4   :  { %3244 = vmatmul.mubr.msk.f32.vlgmr.msra.gmra.mxu1 %vm190_vm0, %v895_v42 }
 0x5b5   :  { %v896_v51 = vmul.f32 %v4396_v46, %v4396_v46  ;;  %3272 = vmatpush3.msra.mxu1 %v137_v41  ;;  %v131_v41 = vld [vmem:[%s5072_s6 + $0xc8] sm:$0xff] }
 0x5b6   :  { %3273 = vmatprep.subr.mxu1 %v136_v54 }
 0x5b7   :  { %3246 = vmatprep.mubr.msk.f32.mxu1 %vm190_vm0, %v896_v51  ;;  %3274 = vmatpush3.msra.mxu1 %v136_v54  ;;  %v130_v54 = vld [vmem:[%s5072_s6 + $0xc0] sm:$0xff] }
 0x5b8   :  { %3247 = vmatmul.mubr.msk.f32.gmra.mxu1 %vm190_vm0, %v897_v62  ;;  %3275 = vmatprep.subr.mxu1 %v135_v60 }
 0x5b9   :  { %3276 = vmatpush3.msra.mxu1 %v135_v60  ;;  %v1021_v60 = vsub.s32 3, %v3995_v50 }
 0x5ba   :  { %3277 = vmatprep.subr.mxu1 %v134_v4 }
 0x5bb   :  { %3278 = vmatpush3.msra.mxu1 %v134_v4  ;;  %v1022_v4 = vrot.slane %v4008_v57, %v1021_v60 }
 0x5bc   :  { %3279 = vmatprep.subr.mxu1 %v133_v5 }
 0x5bd   :  { %3280 = vmatpush3.msra.mxu1 %v133_v5 }
 0x674   :  { %v3245_v7 = vpop.f32.mrf.mxu1 }
 0x675   :  { %v982_v61 = vadd.f32 1e-05, %v3245_v7 }
 0x676   :  { %v976_v8 = vpop.f32.mrf.mxu1 }
 0x677   :  { %3679 = vrsqrt.f32 %v982_v61  ;;  %v977_v9 = vadd.f32 1e-05, %v976_v8 }
 0x678   :  { %v3248_v10 = vpop.f32.mrf.mxu1 }
 0x679   :  { %3681 = vrsqrt.f32 %v977_v9  ;;  %v992_v12 = vadd.f32 1e-05, %v3248_v10 }
 0x67a   :  { %v986_v63 = vpop.f32.mrf.mxu1 }
 0x67b   :  { %3683 = vrsqrt.f32 %v992_v12  ;;  %v987_v11 = vadd.f32 1e-05, %v986_v63 }
 0x67d   :  { %3685 = vrsqrt.f32 %v987_v11 }
 0x684   :  { %v3680_v25 = vpop.eup %3679 }
 0x685   :  { %v1000_v37 = vmul.f32 %v3680_v25, %v4386_v28 }
 0x686   :  { %v3682_v42 = vpop.eup %3681 }
 0x687   :  { %v999_v44 = vmul.f32 %v3682_v42, %v4388_v33  ;;  %v1008_v62 = vmul.f32 %v1006_v30, %v1000_v37 }
 0x688   :  { %v3684_v51 = vpop.eup %3683 }
 0x689   :  { %v1007_v15 = vmul.f32 %v1006_v30, %v999_v44  ;;  %v1002_v14 = vmul.f32 %v3684_v51, %v4394_v43  ;;  %v4460_v27 = vadd.f32 %v1014_v13, %v1008_v62 }
 0x68a   :  { %v3686_v18 = vpop.eup %3685 }
 0x68b   :  { %v4457_v21 = vadd.f32 %v1014_v13, %v1007_v15  ;;  %v1001_v29 = vmul.f32 %v3686_v18, %v4396_v46  ;;  %v1010_v28 = vmul.f32 %v1006_v30, %v1002_v14  ;;  %v132_v46 = vld [vmem:[%s5072_s6 + $0xd0] sm:$0xff] }
 0x68c   :  { %3281 = vmatprep.subr.mxu1 %v132_v46 }
 0x68d   :  { %3265 = vmatprep.mubr.msk.f32.mxu0 %vm190_vm0, %v4457_v21  ;;  %v1009_v33 = vmul.f32 %v1006_v30, %v1001_v29  ;;  %v4469_v43 = vadd.f32 %v1014_v13, %v1010_v28  ;;  %3282 = vmatpush3.msra.mxu1 %v132_v46 }
 0x68e   :  { %3266 = vmatmul.mubr.msk.f32.vlgmr.msra.gmra.mxu0 %vm190_vm0, %v4460_v27  ;;  %3283 = vmatprep.subr.mxu1 %v131_v41 }
 0x68f   :  { %v4466_v31 = vadd.f32 %v1014_v13, %v1009_v33  ;;  %3294 = vmatpush3.msra.mxu0 %v4305_v0  ;;  %3284 = vmatpush3.msra.mxu1 %v131_v41 }
 0x690   :  { %3295 = vmatprep.subr.mxu0 %v4310_v22  ;;  %3285 = vmatprep.subr.mxu1 %v130_v54 }
 0x691   :  { %3268 = vmatprep.mubr.msk.f32.mxu0 %vm190_vm0, %v4466_v31  ;;  %3296 = vmatpush3.msra.mxu0 %v4310_v22 }
 0x692   :  { %3269 = vmatmul.mubr.msk.f32.gmra.mxu0 %vm190_vm0, %v4469_v43  ;;  %3297 = vmatprep.subr.mxu0 %v4317_v23 }
 0x693   :  { %3298 = vmatpush3.msra.mxu0 %v4317_v23  ;;  %3286 = vmatpush3.msra.mxu1 %v130_v54 }
 0x694   :  { %3299 = vmatprep.subr.mxu0 %v4324_v26  ;;  %3315 = vmatprep.subr.mxu1 %v4305_v0 }
 0x695   :  { %3300 = vmatpush3.msra.mxu0 %v4324_v26 }
 0x696   :  { %3301 = vmatprep.subr.mxu0 %v4333_v45 }
 0x697   :  { %3302 = vmatpush3.msra.mxu0 %v4333_v45 }
 0x698   :  { %3303 = vmatprep.subr.mxu0 %v4340_v53 }
 0x699   :  { %3304 = vmatpush3.msra.mxu0 %v4340_v53 }
 0x69a   :  { %3305 = vmatprep.subr.mxu0 %v4347_v56 }
 0x69b   :  { %3306 = vmatpush3.msra.mxu0 %v4347_v56 }
 0x69c   :  { %3307 = vmatprep.subr.mxu0 %v4354_v58 }
 0x69d   :  { %3308 = vmatpush3.msra.mxu0 %v4354_v58 }
 0x74e   :  { %v3267_v5 = vpop.f32.mrf.mxu0 }
 0x74f   :  { %v1107_v7 = vadd.f32 %v3267_v5, %v1022_v4  ;;  %v101_v5 = vld [vmem:[%s5071_s5 + $0xd8] sm:$0xff] }
 0x750   :  { %v1101_v61 = vpop.f32.mrf.mxu0 }
 0x751   :  { %v1102_v8 = vadd.f32 %v1101_v61, %v1022_v4  ;;  %v1121_v12 = vmax.f32 %v1107_v7, 0.0  ;;  %v97_v7 = vld [vmem:[%s5071_s5 + $0xb8] sm:$0xff] }
 0x752   :  { %v3270_v9 = vpop.f32.mrf.mxu0  ;;  %v93_v61 = vld [vmem:[%s5071_s5 + $0x98] sm:$0xff] }
 0x753   :  { %v1120_v10 = vmax.f32 %v1102_v8, 0.0  ;;  %v1117_v63 = vadd.f32 %v3270_v9, %v1022_v4  ;;  %v89_v8 = vld [vmem:[%s5071_s5 + $0x78] sm:$0xff] }
 0x754   :  { %v1111_v11 = vpop.f32.mrf.mxu0  ;;  %v85_v9 = vld [vmem:[%s5071_s5 + $0x58] sm:$0xff] }
 0x755   :  { %v1112_v25 = vadd.f32 %v1111_v11, %v1022_v4  ;;  %3287 = vmatprep.mubr.msk.f32.mxu1 %vm190_vm0, %v1120_v10  ;;  %v1123_v37 = vmax.f32 %v1117_v63, 0.0  ;;  %v105_v4 = vld [vmem:[%s5071_s5 + $0xf8] sm:$0xff] }
 0x756   :  { %3288 = vmatmul.mubr.msk.f32.vlgmr.msra.gmra.mxu1 %vm190_vm0, %v1121_v12  ;;  %3337 = vmatprep.subr.mxu0 %v105_v4  ;;  %v81_v10 = vld [vmem:[%s5071_s5 + $0x38] sm:$0xff] }
 0x757   :  { %v1122_v30 = vmax.f32 %v1112_v25, 0.0  ;;  %3316 = vmatpush3.msra.mxu1 %v4305_v0  ;;  %v77_v12 = vld [vmem:[%s5071_s5 + $0x18] sm:$0xff] }
 0x758   :  { %3317 = vmatprep.subr.mxu1 %v4310_v22  ;;  %v3727_v63 = vld [vmem:[%s5070_s4 + $0x78] sm:$0xff] }
 0x759   :  { %3318 = vmatpush3.msra.mxu1 %v4310_v22  ;;  %3290 = vmatprep.mubr.msk.f32.mxu1 %vm190_vm0, %v1122_v30  ;;  %v4523_v22 = vmul.f32 %v4101_v40, %v4079_v24 }
 0x75a   :  { %3319 = vmatprep.subr.mxu1 %v4317_v23  ;;  %3291 = vmatmul.mubr.msk.f32.gmra.mxu1 %vm190_vm0, %v1123_v37 }
 0x75b   :  { %3320 = vmatpush3.msra.mxu1 %v4317_v23  ;;  %v1126_v23 = vsub.s32 4, %v3995_v50 }
 0x75c   :  { %3321 = vmatprep.subr.mxu1 %v4324_v26 }
 0x75d   :  { %3322 = vmatpush3.msra.mxu1 %v4324_v26  ;;  %v1127_v26 = vrot.slane %v4008_v57, %v1126_v23 }
 0x75e   :  { %3323 = vmatprep.subr.mxu1 %v4333_v45 }
 0x75f   :  { %3324 = vmatpush3.msra.mxu1 %v4333_v45 }
 0x760   :  { %3325 = vmatprep.subr.mxu1 %v4340_v53 }
 0x761   :  { %3326 = vmatpush3.msra.mxu1 %v4340_v53 }
 0x762   :  { %3327 = vmatprep.subr.mxu1 %v4347_v56 }
 0x763   :  { %3328 = vmatpush3.msra.mxu1 %v4347_v56 }
 0x764   :  { %3329 = vmatprep.subr.mxu1 %v4354_v58 }
 0x765   :  { %3330 = vmatpush3.msra.mxu1 %v4354_v58 }
 0x766   :  { %3359 = vmatprep.subr.mxu1 %v4523_v22 }
 0x816   :  { %v3289_v45 = vpop.f32.mrf.mxu1 }
 0x817   :  { %v1212_v53 = vadd.f32 %v3289_v45, %v1127_v26 }
 0x818   :  { %v1206_v42 = vpop.f32.mrf.mxu1 }
 0x819   :  { %v1207_v56 = vadd.f32 %v1206_v42, %v1127_v26  ;;  %v1226_v24 = vadd.f32 %v1212_v53, %v4460_v27 }
 0x81a   :  { %v3292_v44 = vpop.f32.mrf.mxu1 }
 0x81b   :  { %v1225_v51 = vadd.f32 %v1207_v56, %v4457_v21  ;;  %v1222_v40 = vadd.f32 %v3292_v44, %v1127_v26  ;;  %v1441_v56 = vsub.s32 7, %v3995_v50 }
 0x81c   :  { %v1216_v62 = vpop.f32.mrf.mxu1 }
 0x81d   :  { %v1217_v13 = vadd.f32 %v1216_v62, %v1127_v26  ;;  %3309 = vmatprep.mubr.msk.f32.mxu0 %vm190_vm0, %v1225_v51  ;;  %v1228_v57 = vadd.f32 %v1222_v40, %v4469_v43  ;;  %v4627_v62 = vld [vmem:[%s5073_s7 + $0x10] sm:$0xff] }
 0x81e   :  { %3310 = vmatmul.mubr.msk.f32.vlgmr.msra.gmra.mxu0 %vm190_vm0, %v1226_v24 }
 0x81f   :  { %v1227_v15 = vadd.f32 %v1217_v13, %v4466_v31  ;;  %3338 = vmatpush3.msra.mxu0 %v105_v4 }
 0x820   :  { %3339 = vmatprep.subr.mxu0 %v101_v5 }
 0x821   :  { %3312 = vmatprep.mubr.msk.f32.mxu0 %vm190_vm0, %v1227_v15  ;;  %3340 = vmatpush3.msra.mxu0 %v101_v5  ;;  %v3731_v5 = vld [vmem:[%s5070_s4 + $0x60] sm:$0xff] }
 0x822   :  { %3313 = vmatmul.mubr.msk.f32.gmra.mxu0 %vm190_vm0, %v1228_v57  ;;  %3341 = vmatprep.subr.mxu0 %v97_v7 }
 0x823   :  { %3342 = vmatpush3.msra.mxu0 %v97_v7  ;;  %v3732_v7 = vld [vmem:[%s5070_s4 + $0x58] sm:$0xff] }
 0x824   :  { %3343 = vmatprep.subr.mxu0 %v93_v61 }
 0x825   :  { %3344 = vmatpush3.msra.mxu0 %v93_v61  ;;  %v3733_v61 = vld [vmem:[%s5070_s4 + $0x50] sm:$0xff] }
 0x826   :  { %3345 = vmatprep.subr.mxu0 %v89_v8 }
 0x827   :  { %3346 = vmatpush3.msra.mxu0 %v89_v8  ;;  %v3734_v8 = vld [vmem:[%s5070_s4 + $0x48] sm:$0xff] }
 0x828   :  { %3347 = vmatprep.subr.mxu0 %v85_v9 }
 0x829   :  { %3348 = vmatpush3.msra.mxu0 %v85_v9  ;;  %v3735_v9 = vld [vmem:[%s5070_s4 + $0x40] sm:$0xff] }
 0x82a   :  { %3349 = vmatprep.subr.mxu0 %v81_v10 }
 0x82b   :  { %3350 = vmatpush3.msra.mxu0 %v81_v10  ;;  %v3736_v10 = vld [vmem:[%s5070_s4 + $0x38] sm:$0xff] }
 0x82c   :  { %3351 = vmatprep.subr.mxu0 %v77_v12 }
 0x82d   :  { %3352 = vmatpush3.msra.mxu0 %v77_v12  ;;  %v3737_v12 = vld [vmem:[%s5070_s4 + $0x30] sm:$0xff] }
 0x82e   :  { %3397 = vmatprep.subr.mxu0 %v3727_v63 }
 0x8de   :  { %v3311_v14 = vpop.f32.mrf.mxu0 }
 0x8df   :  { %v4539_v18 = vsub.f32 %v1226_v24, %v3311_v14 }
 0x8e0   :  { %v1307_v21 = vpop.f32.mrf.mxu0 }
 0x8e1   :  { %v4541_v29 = vsub.f32 %v1225_v51, %v1307_v21  ;;  %v1331_v33 = vmul.f32 %v4539_v18, %v4539_v18  ;;  %v3728_v51 = vld [vmem:[%s5073_s7] sm:$0xff]  ;;  %v1450_v21 = vrot.slane %v4627_v62, %v4001_v52 }
 0x8e2   :  { %v3314_v27 = vpop.f32.mrf.mxu0  ;;  %v1442_v24 = vrot.slane %v3728_v51, %v1441_v56 }
 0x8e3   :  { %v1330_v28 = vmul.f32 %v4541_v29, %v4541_v29  ;;  %v4547_v31 = vsub.f32 %v1228_v57, %v3314_v27 }
 0x8e4   :  { %v1317_v43 = vpop.f32.mrf.mxu0 }
 0x8e5   :  { %v4549_v46 = vsub.f32 %v1227_v15, %v1317_v43  ;;  %3331 = vmatprep.mubr.msk.f32.mxu1 %vm190_vm0, %v1330_v28  ;;  %v1333_v54 = vmul.f32 %v4547_v31, %v4547_v31 }
 0x8e6   :  { %3332 = vmatmul.mubr.msk.f32.vlgmr.msra.gmra.mxu1 %vm190_vm0, %v1331_v33 }
 0x8e7   :  { %v1332_v41 = vmul.f32 %v4549_v46, %v4549_v46  ;;  %3360 = vmatpush3.xpose.msra.mxu1 %v4523_v22 }
 0x8e8   :  { %3361 = vmatprep.subr.mxu1 %v4093_v35 }
 0x8e9   :  { %3334 = vmatprep.mubr.msk.f32.mxu1 %vm190_vm0, %v1332_v41 }
 0x8ea   :  { %3335 = vmatmul.mubr.msk.f32.gmra.mxu1 %vm190_vm0, %v1333_v54 }
 0x8eb   :  { %3362 = vmatpush3.xpose.msra.mxu1 %v4093_v35 }
 0x8ec   :  { %3363 = vmatprep.subr.mxu1 %v4064_v16 }
 0x8ef   :  { %3364 = vmatpush3.xpose.msra.mxu1 %v4064_v16 }
 0x8f0   :  { %3365 = vmatprep.subr.mxu1 %v4033_v1 }
 0x8f3   :  { %3366 = vmatpush3.xpose.msra.mxu1 %v4033_v1 }
 0x8f4   :  { %3367 = vmatprep.subr.mxu1 %v4120_v47 }
 0x8f7   :  { %3368 = vmatpush3.xpose.msra.mxu1 %v4120_v47 }
 0x8f8   :  { %3369 = vmatprep.subr.mxu1 %v4095_v36 }
 0x8fb   :  { %3370 = vmatpush3.xpose.msra.mxu1 %v4095_v36 }
 0x8fc   :  { %3371 = vmatprep.subr.mxu1 %v4066_v17 }
 0x8ff   :  { %3372 = vmatpush3.xpose.msra.mxu1 %v4066_v17 }
 0x900   :  { %3373 = vmatprep.subr.mxu1 %v4036_v2 }
 0x903   :  { %3374 = vmatpush3.xpose.msra.mxu1 %v4036_v2 }
 0x904   :  { %3375 = vmatprep.subr.mxu1 %v4123_v48 }
 0x907   :  { %3376 = vmatpush3.xpose.msra.mxu1 %v4123_v48 }
 0x908   :  { %3377 = vmatprep.subr.mxu1 %v4097_v38 }
 0x90b   :  { %3378 = vmatpush3.xpose.msra.mxu1 %v4097_v38 }
 0x90c   :  { %3379 = vmatprep.subr.mxu1 %v4069_v19 }
 0x90f   :  { %3380 = vmatpush3.xpose.msra.mxu1 %v4069_v19 }
 0x910   :  { %3381 = vmatprep.subr.mxu1 %v4039_v3 }
 0x913   :  { %3382 = vmatpush3.xpose.msra.mxu1 %v4039_v3 }
 0x914   :  { %3383 = vmatprep.subr.mxu1 %v4127_v49 }
 0x917   :  { %3384 = vmatpush3.xpose.msra.mxu1 %v4127_v49 }
 0x918   :  { %3385 = vmatprep.subr.mxu1 %v4099_v39 }
 0x91b   :  { %3386 = vmatpush3.xpose.msra.mxu1 %v4099_v39 }
 0x91c   :  { %3387 = vmatprep.subr.mxu1 %v4072_v20 }
 0x91f   :  { %3388 = vmatpush3.xpose.msra.mxu1 %v4072_v20 }
 0x920   :  { %3389 = vmatprep.subr.mxu1 %v4042_v6 }
 0x923   :  { %3390 = vmatpush3.xpose.msra.mxu1 %v4042_v6 }
 0x9a6   :  { %v3333_v11 = vpop.f32.mrf.mxu1 }
 0x9a7   :  { %v1418_v25 = vadd.f32 1e-05, %v3333_v11  ;;  %v3739_v11 = vld [vmem:[%s5070_s4 + $0x20] sm:$0xff] }
 0x9a8   :  { %v1412_v30 = vpop.f32.mrf.mxu1 }
 0x9a9   :  { %3687 = vrsqrt.f32 %v1418_v25  ;;  %v1413_v37 = vadd.f32 1e-05, %v1412_v30  ;;  %v3740_v25 = vld [vmem:[%s5070_s4 + $0x18] sm:$0xff]  ;;  %v3741_v30 = vld [vmem:[%s5070_s4 + $0x10] sm:$0xff] }
 0x9aa   :  { %v3336_v26 = vpop.f32.mrf.mxu1 }
 0x9ab   :  { %3689 = vrsqrt.f32 %v1413_v37  ;;  %v1428_v45 = vadd.f32 1e-05, %v3336_v26  ;;  %v3742_v37 = vld [vmem:[%s5070_s4 + $0x8] sm:$0xff]  ;;  %v3743_v26 = vld [vmem:[%s5070_s4] sm:$0xff] }
 0x9ac   :  { %v1422_v53 = vpop.f32.mrf.mxu1 }
 0x9ad   :  { %3691 = vrsqrt.f32 %v1428_v45  ;;  %v1423_v42 = vadd.f32 1e-05, %v1422_v53  ;;  %v1458_v45 = vrot.slane %v4627_v62, %v294_v55  ;;  %v3744_v55 = vld [vmem:[%s5068_s2 + $0x8] sm:$0xff] }
 0x9af   :  { %3693 = vrsqrt.f32 %v1423_v42 }
 0x9b6   :  { %v3688_v44 = vpop.eup %3687 }
 0x9b7   :  { %v1436_v40 = vmul.f32 %v3688_v44, %v4539_v18 }
 0x9b8   :  { %v3690_v13 = vpop.eup %3689 }
 0x9b9   :  { %v1435_v15 = vmul.f32 %v3690_v13, %v4541_v29  ;;  %v1444_v14 = vmul.f32 %v1442_v24, %v1436_v40 }
 0x9ba   :  { %v3692_v57 = vpop.eup %3691 }
 0x9bb   :  { %v1443_v27 = vmul.f32 %v1442_v24, %v1435_v15  ;;  %v1438_v28 = vmul.f32 %v3692_v57, %v4547_v31  ;;  %v4636_v41 = vadd.f32 %v1450_v21, %v1444_v14  ;;  %v3729_v31 = vld [vmem:[%s5070_s4 + $0x70] sm:$0xff] }
 0x9bc   :  { %v3694_v33 = vpop.eup %3693 }
 0x9bd   :  { %v4633_v43 = vadd.f32 %v1450_v21, %v1443_v27  ;;  %v1437_v18 = vmul.f32 %v3694_v33, %v4549_v46  ;;  %v1446_v54 = vmul.f32 %v1442_v24, %v1438_v28  ;;  %v3730_v46 = vld [vmem:[%s5070_s4 + $0x68] sm:$0xff] }
 0x9bf   :  { %3353 = vmatprep.mubr.msk.f32.mxu0 %vm190_vm0, %v4633_v43  ;;  %v1445_v29 = vmul.f32 %v1442_v24, %v1437_v18  ;;  %v4647_v4 = vadd.f32 %v1450_v21, %v1446_v54  ;;  %v3745_v54 = vld [vmem:[%s5068_s2] sm:$0xff] }
 0x9c0   :  { %3354 = vmatmul.mubr.msk.f32.vlgmr.msra.gmra.mxu0 %vm190_vm0, %v4636_v41 }
 0x9c1   :  { %3398 = vmatpush3.msra.mxu0 %v3727_v63  ;;  %v4642_v52 = vadd.f32 %v1450_v21, %v1445_v29  ;;  %v3738_v63 = vld [vmem:[%s5070_s4 + $0x28] sm:$0xff] }
 0x9c2   :  { %3399 = vmatprep.subr.mxu0 %v3729_v31 }
 0x9c3   :  { %3400 = vmatpush3.msra.mxu0 %v3729_v31  ;;  %3356 = vmatprep.mubr.msk.f32.mxu0 %vm190_vm0, %v4642_v52 }
 0x9c4   :  { %3401 = vmatprep.subr.mxu0 %v3730_v46  ;;  %3357 = vmatmul.mubr.msk.f32.gmra.mxu0 %vm190_vm0, %v4647_v4 }
 0x9c5   :  { %3402 = vmatpush3.msra.mxu0 %v3730_v46 }
 0x9c6   :  { %3403 = vmatprep.subr.mxu0 %v3731_v5 }
 0x9c7   :  { %3404 = vmatpush3.msra.mxu0 %v3731_v5  ;;  %v3746_v5 = vld [vmem:[%s5068_s2 + $0x18] sm:$0xff] }
 0x9c8   :  { %3405 = vmatprep.subr.mxu0 %v3732_v7 }
 0x9c9   :  { %3406 = vmatpush3.msra.mxu0 %v3732_v7 }
 0x9ca   :  { %3407 = vmatprep.subr.mxu0 %v3733_v61 }
 0x9cb   :  { %3408 = vmatpush3.msra.mxu0 %v3733_v61  ;;  %v3747_v61 = vld [vmem:[%s5068_s2 + $0x10] sm:$0xff] }
 0x9cc   :  { %3409 = vmatprep.subr.mxu0 %v3734_v8 }
 0x9cd   :  { %3410 = vmatpush3.msra.mxu0 %v3734_v8 }
 0x9ce   :  { %3411 = vmatprep.subr.mxu0 %v3735_v9 }
 0x9cf   :  { %3412 = vmatpush3.msra.mxu0 %v3735_v9 }
 0x9d0   :  { %3413 = vmatprep.subr.mxu0 %v3736_v10 }
 0x9d1   :  { %3414 = vmatpush3.msra.mxu0 %v3736_v10 }
 0x9d2   :  { %3415 = vmatprep.subr.mxu0 %v3737_v12 }
 0x9d3   :  { %3416 = vmatpush3.msra.mxu0 %v3737_v12 }
 0x9d4   :  { %3417 = vmatprep.subr.mxu0 %v3738_v63 }
 0x9d5   :  { %3418 = vmatpush3.msra.mxu0 %v3738_v63 }
 0x9d6   :  { %3419 = vmatprep.subr.mxu0 %v3739_v11 }
 0x9d7   :  { %3420 = vmatpush3.msra.mxu0 %v3739_v11 }
 0x9d8   :  { %3421 = vmatprep.subr.mxu0 %v3740_v25 }
 0x9d9   :  { %3422 = vmatpush3.msra.mxu0 %v3740_v25 }
 0x9da   :  { %3423 = vmatprep.subr.mxu0 %v3741_v30 }
 0x9db   :  { %3424 = vmatpush3.msra.mxu0 %v3741_v30 }
 0x9dc   :  { %3425 = vmatprep.subr.mxu0 %v3742_v37 }
 0x9dd   :  { %3426 = vmatpush3.msra.mxu0 %v3742_v37 }
 0x9de   :  { %3427 = vmatprep.subr.mxu0 %v3743_v26 }
 0x9df   :  { %3428 = vmatpush3.msra.mxu0 %v3743_v26 }
 0x9e0   :  { %3435 = vmatprep.subr.mxu0 %v4523_v22 }
 0xa80   :  { %v3355_v53 = vpop.f32.mrf.mxu0 }
 0xa81   :  { %v1543_v51 = vadd.f32 %v3355_v53, %v1458_v45 }
 0xa82   :  { %v1537_v42 = vpop.f32.mrf.mxu0 }
 0xa83   :  { %v1538_v44 = vadd.f32 %v1537_v42, %v1458_v45 }
 0xa84   :  { %v3358_v24 = vpop.f32.mrf.mxu0 }
 0xa85   :  { %3391 = vmatprep.mubr.f32.mxu1 %v1538_v44  ;;  %v1553_v15 = vadd.f32 %v3358_v24, %v1458_v45 }
 0xa86   :  { %v1547_v40 = vpop.f32.mrf.mxu0  ;;  %3392 = vmatmul.mubr.f32.vlgmr.msra.gmra.mxu1 %v1543_v51 }
 0xa87   :  { %v1548_v13 = vadd.f32 %v1547_v40, %v1458_v45 }
 0xa89   :  { %3394 = vmatprep.mubr.f32.mxu1 %v1548_v13 }
 0xa8a   :  { %3395 = vmatmul.mubr.f32.gmra.mxu1 %v1553_v15 }
 0xb46   :  { %v3393_v57 = vpop.f32.mrf.mxu1 }
 0xb47   :  { %v1658_v14 = vmul.f32 0.25, %v3393_v57 }
 0xb48   :  { %v1638_v21 = vpop.f32.mrf.mxu1 }
 0xb49   :  { %v1657_v27 = vmul.f32 0.25, %v1638_v21  ;;  %v1662_v28 = vadd.f32 %v3744_v55, %v1658_v14 }
 0xb4a   :  { %v3396_v33 = vpop.f32.mrf.mxu1 }
 0xb4b   :  { %v1660_v18 = vmul.f32 0.25, %v3396_v33  ;;  %1667 = vmax.xlane.f32.xlu1 %v1662_v28  ;;  %v1661_v29 = vadd.f32 %v3745_v54, %v1657_v27 }
 0xb4c   :  { %v1648_v31 = vpop.f32.mrf.mxu1 }
 0xb4d   :  { %v1659_v46 = vmul.f32 0.25, %v1648_v31  ;;  %1665 = vmax.xlane.f32.xlu0 %v1661_v29  ;;  %v1664_v7 = vadd.f32 %v3746_v5, %v1660_v18  ;;  %v4803_v31 = vld [vmem:[%s5072_s6 + $0x238] sm:$0xff]  ;;  %v4810_v5 = vld [vmem:[%s5072_s6 + $0x230] sm:$0xff] }
 0xb4f   :  { %1671 = vmax.xlane.f32.xlu1 %v1664_v7  ;;  %v1663_v8 = vadd.f32 %v3747_v61, %v1659_v46  ;;  %v4824_v61 = vld [vmem:[%s5072_s6 + $0x220] sm:$0xff] }
 0xb51   :  { %1669 = vmax.xlane.f32.xlu0 %v1663_v8 }
 0xbd4   :  { %v1668_v9 = vpop.xlane.xlu1 %1667 }
 0xbd5   :  { %v1674_v10 = vsub.f32 %v1662_v28, %v1668_v9  ;;  %v4838_v9 = vld [vmem:[%s5072_s6 + $0x210] sm:$0xff] }
 0xbd6   :  { %v1666_v12 = vpop.xlane.xlu0 %1665 }
 0xbd7   :  { %v1673_v63 = vsub.f32 %v1661_v29, %v1666_v12  ;;  %v1679_v11 = vmul.f32 1.442695, %v1674_v10  ;;  %v4845_v10 = vld [vmem:[%s5072_s6 + $0x208] sm:$0xff]  ;;  %v4853_v12 = vld [vmem:[%s5072_s6 + $0x200] sm:$0xff] }
 0xbd8   :  { %v1672_v25 = vpop.xlane.xlu1 %1671 }
 0xbd9   :  { %v1677_v30 = vmul.f32 1.442695, %v1673_v63  ;;  %v1676_v37 = vsub.f32 %v1664_v7, %v1672_v25  ;;  %v4817_v7 = vld [vmem:[%s5072_s6 + $0x228] sm:$0xff] }
 0xbda   :  { %v1670_v26 = vpop.xlane.xlu0 %1669  ;;  %v139_v63 = vld [vmem:[%s5072_s6 + $0x108] sm:$0xff] }
 0xbdb   :  { %3695 = vpow2.f32 %v1677_v30  ;;  %v1675_v45 = vsub.f32 %v1663_v8, %v1670_v26  ;;  %v1683_v53 = vmul.f32 1.442695, %v1676_v37  ;;  %v4831_v8 = vld [vmem:[%s5072_s6 + $0x218] sm:$0xff]  ;;  %v1866_v26 = vrot.slane %v4627_v62, %v702_v59 }
 0xbdc   :  { %3697 = vpow2.f32 %v1679_v11  ;;  %v138_v11 = vld [vmem:[%s5072_s6 + $0x100] sm:$0xff] }
 0xbdd   :  { %v1681_v42 = vmul.f32 1.442695, %v1675_v45 }
 0xbdf   :  { %3699 = vpow2.f32 %v1681_v42 }
 0xbe0   :  { %3701 = vpow2.f32 %v1683_v53 }
 0xbe8   :  { %v4711_v44 = vpop.eup %3695 }
 0xbe9   :  { %v4713_v51 = vpop.eup %3697  ;;  %3429 = vmatprep.mubr.f32.mxu0 %v4711_v44 }
 0xbea   :  { %3430 = vmatmul.mubr.f32.vlgmr.msra.gmra.mxu0 %v4713_v51 }
 0xbeb   :  { %3436 = vmatpush3.msra.mxu0 %v4523_v22 }
 0xbec   :  { %v4718_v24 = vpop.eup %3699  ;;  %3437 = vmatprep.subr.mxu0 %v4093_v35 }
 0xbed   :  { %v4721_v40 = vpop.eup %3701  ;;  %3438 = vmatpush3.msra.mxu0 %v4093_v35  ;;  %3432 = vmatprep.mubr.f32.mxu0 %v4718_v24  ;;  %v145_v35 = vld [vmem:[%s5072_s6 + $0x138] sm:$0xff] }
 0xbee   :  { %3439 = vmatprep.subr.mxu0 %v4064_v16  ;;  %3433 = vmatmul.mubr.f32.gmra.mxu0 %v4721_v40 }
 0xbef   :  { %3440 = vmatpush3.msra.mxu0 %v4064_v16  ;;  %v149_v16 = vld [vmem:[%s5072_s6 + $0x158] sm:$0xff] }
 0xbf0   :  { %3441 = vmatprep.subr.mxu0 %v4033_v1 }
 0xbf1   :  { %3442 = vmatpush3.msra.mxu0 %v4033_v1  ;;  %v153_v1 = vld [vmem:[%s5072_s6 + $0x178] sm:$0xff] }
 0xbf2   :  { %3443 = vmatprep.subr.mxu0 %v4120_v47  ;;  %3473 = vmatprep.subr.mxu1 %v153_v1 }
 0xbf3   :  { %3444 = vmatpush3.msra.mxu0 %v4120_v47  ;;  %3474 = vmatpush3.msra.mxu1 %v153_v1  ;;  %v141_v47 = vld [vmem:[%s5072_s6 + $0x118] sm:$0xff] }
 0xbf4   :  { %3445 = vmatprep.subr.mxu0 %v4095_v36 }
 0xbf5   :  { %3446 = vmatpush3.msra.mxu0 %v4095_v36  ;;  %v144_v36 = vld [vmem:[%s5072_s6 + $0x130] sm:$0xff] }
 0xbf6   :  { %3447 = vmatprep.subr.mxu0 %v4066_v17 }
 0xbf7   :  { %3448 = vmatpush3.msra.mxu0 %v4066_v17  ;;  %v148_v17 = vld [vmem:[%s5072_s6 + $0x150] sm:$0xff] }
 0xbf8   :  { %3449 = vmatprep.subr.mxu0 %v4036_v2 }
 0xbf9   :  { %3450 = vmatpush3.msra.mxu0 %v4036_v2  ;;  %v152_v2 = vld [vmem:[%s5072_s6 + $0x170] sm:$0xff] }
 0xbfa   :  { %3451 = vmatprep.subr.mxu0 %v4123_v48  ;;  %3475 = vmatprep.subr.mxu1 %v152_v2 }
 0xbfb   :  { %3452 = vmatpush3.msra.mxu0 %v4123_v48  ;;  %3476 = vmatpush3.msra.mxu1 %v152_v2  ;;  %v140_v48 = vld [vmem:[%s5072_s6 + $0x110] sm:$0xff] }
 0xbfc   :  { %3453 = vmatprep.subr.mxu0 %v4097_v38 }
 0xbfd   :  { %3454 = vmatpush3.msra.mxu0 %v4097_v38  ;;  %v143_v38 = vld [vmem:[%s5072_s6 + $0x128] sm:$0xff] }
 0xbfe   :  { %3455 = vmatprep.subr.mxu0 %v4069_v19 }
 0xbff   :  { %3456 = vmatpush3.msra.mxu0 %v4069_v19  ;;  %v147_v19 = vld [vmem:[%s5072_s6 + $0x148] sm:$0xff] }
 0xc00   :  { %3457 = vmatprep.subr.mxu0 %v4039_v3 }
 0xc01   :  { %3458 = vmatpush3.msra.mxu0 %v4039_v3  ;;  %v151_v3 = vld [vmem:[%s5072_s6 + $0x168] sm:$0xff] }
 0xc02   :  { %3459 = vmatprep.subr.mxu0 %v4127_v49  ;;  %3477 = vmatprep.subr.mxu1 %v151_v3 }
 0xc03   :  { %3460 = vmatpush3.msra.mxu0 %v4127_v49  ;;  %3478 = vmatpush3.msra.mxu1 %v151_v3 }
 0xc04   :  { %3461 = vmatprep.subr.mxu0 %v4099_v39 }
 0xc05   :  { %3462 = vmatpush3.msra.mxu0 %v4099_v39  ;;  %v142_v39 = vld [vmem:[%s5072_s6 + $0x120] sm:$0xff] }
 0xc06   :  { %3463 = vmatprep.subr.mxu0 %v4072_v20 }
 0xc07   :  { %3464 = vmatpush3.msra.mxu0 %v4072_v20  ;;  %v146_v20 = vld [vmem:[%s5072_s6 + $0x140] sm:$0xff] }
 0xc08   :  { %3465 = vmatprep.subr.mxu0 %v4042_v6 }
 0xc09   :  { %3466 = vmatpush3.msra.mxu0 %v4042_v6  ;;  %v150_v6 = vld [vmem:[%s5072_s6 + $0x160] sm:$0xff] }
 0xc0a   :  { %3511 = vmatprep.subr.mxu0 %v4305_v0  ;;  %3479 = vmatprep.subr.mxu1 %v150_v6 }
 0xc0b   :  { %3480 = vmatpush3.msra.mxu1 %v150_v6 }
 0xc0c   :  { %3481 = vmatprep.subr.mxu1 %v149_v16 }
 0xc0d   :  { %3482 = vmatpush3.msra.mxu1 %v149_v16 }
 0xc0e   :  { %3483 = vmatprep.subr.mxu1 %v148_v17 }
 0xc0f   :  { %3484 = vmatpush3.msra.mxu1 %v148_v17 }
 0xc10   :  { %3485 = vmatprep.subr.mxu1 %v147_v19 }
 0xc11   :  { %3486 = vmatpush3.msra.mxu1 %v147_v19 }
 0xc12   :  { %3487 = vmatprep.subr.mxu1 %v146_v20 }
 0xc13   :  { %3488 = vmatpush3.msra.mxu1 %v146_v20 }
 0xc14   :  { %3489 = vmatprep.subr.mxu1 %v145_v35 }
 0xc15   :  { %3490 = vmatpush3.msra.mxu1 %v145_v35 }
 0xc16   :  { %3491 = vmatprep.subr.mxu1 %v144_v36 }
 0xc17   :  { %3492 = vmatpush3.msra.mxu1 %v144_v36 }
 0xc18   :  { %3493 = vmatprep.subr.mxu1 %v143_v38 }
 0xc19   :  { %3494 = vmatpush3.msra.mxu1 %v143_v38 }
 0xc1a   :  { %3495 = vmatprep.subr.mxu1 %v142_v39 }
 0xc1b   :  { %3496 = vmatpush3.msra.mxu1 %v142_v39 }
 0xc1c   :  { %3497 = vmatprep.subr.mxu1 %v141_v47 }
 0xc1d   :  { %3498 = vmatpush3.msra.mxu1 %v141_v47  ;;  %v161_v47 = vld [vmem:[%s5072_s6 + $0x1b8] sm:$0xff] }
 0xc1e   :  { %3499 = vmatprep.subr.mxu1 %v140_v48 }
 0xc1f   :  { %3500 = vmatpush3.msra.mxu1 %v140_v48  ;;  %v160_v48 = vld [vmem:[%s5072_s6 + $0x1b0] sm:$0xff] }
 0xc20   :  { %3501 = vmatprep.subr.mxu1 %v139_v63 }
 0xc21   :  { %3502 = vmatpush3.msra.mxu1 %v139_v63 }
 0xc22   :  { %3503 = vmatprep.subr.mxu1 %v138_v11 }
 0xc23   :  { %3504 = vmatpush3.msra.mxu1 %v138_v11 }
 0xc24   :  { %3555 = vmatprep.subr.mxu1 %v161_v47 }
 0xcaa   :  { %v3431_v49 = vpop.f32.mrf.mxu0 }
 0xcab   :  { %v1757_v0 = vadd.f32 1e-12, %v3431_v49  ;;  %v159_v49 = vld [vmem:[%s5072_s6 + $0x1a8] sm:$0xff] }
 0xcac   :  { %v1751_v22 = vpop.f32.mrf.mxu0 }
 0xcad   :  { %v1752_v13 = vadd.f32 1e-12, %v1751_v22  ;;  %3703 = vrcp.f32 %v1757_v0  ;;  %v158_v0 = vld [vmem:[%s5072_s6 + $0x1a0] sm:$0xff]  ;;  %v157_v22 = vld [vmem:[%s5072_s6 + $0x198] sm:$0xff] }
 0xcae   :  { %v3434_v15 = vpop.f32.mrf.mxu0 }
 0xcaf   :  { %3705 = vrcp.f32 %v1752_v13  ;;  %v1767_v57 = vadd.f32 1e-12, %v3434_v15  ;;  %v156_v13 = vld [vmem:[%s5072_s6 + $0x190] sm:$0xff]  ;;  %v155_v15 = vld [vmem:[%s5072_s6 + $0x188] sm:$0xff] }
 0xcb0   :  { %v1761_v14 = vpop.f32.mrf.mxu0 }
 0xcb1   :  { %v1762_v21 = vadd.f32 1e-12, %v1761_v14  ;;  %3707 = vrcp.f32 %v1767_v57  ;;  %v154_v57 = vld [vmem:[%s5072_s6 + $0x180] sm:$0xff]  ;;  %v169_v14 = vld [vmem:[%s5072_s6 + $0x1f8] sm:$0xff] }
 0xcb3   :  { %3709 = vrcp.f32 %v1762_v21  ;;  %v168_v21 = vld [vmem:[%s5072_s6 + $0x1f0] sm:$0xff] }
 0xcba   :  { %v3704_v27 = vpop.eup %3703 }
 0xcbb   :  { %v1775_v33 = vmul.f32 %v3704_v27, %v4713_v51  ;;  %v167_v27 = vld [vmem:[%s5072_s6 + $0x1e8] sm:$0xff] }
 0xcbc   :  { %v3706_v55 = vpop.eup %3705 }
 0xcbd   :  { %v1774_v28 = vmul.f32 %v3706_v55, %v4711_v44  ;;  %v166_v55 = vld [vmem:[%s5072_s6 + $0x1e0] sm:$0xff] }
 0xcbe   :  { %v3708_v18 = vpop.eup %3707 }
 0xcbf   :  { %3467 = vmatprep.mubr.f32.mxu0 %v1774_v28  ;;  %v1777_v46 = vmul.f32 %v3708_v18, %v4721_v40 }
 0xcc0   :  { %v3710_v54 = vpop.eup %3709  ;;  %3468 = vmatmul.mubr.f32.vlgmr.msra.gmra.mxu0 %v1775_v33 }
 0xcc1   :  { %v1776_v29 = vmul.f32 %v3710_v54, %v4718_v24  ;;  %3512 = vmatpush3.msra.mxu0 %v4803_v31 }
 0xcc2   :  { %3513 = vmatprep.subr.mxu0 %v4810_v5 }
 0xcc3   :  { %3470 = vmatprep.mubr.f32.mxu0 %v1776_v29  ;;  %3514 = vmatpush3.msra.mxu0 %v4810_v5 }
 0xcc4   :  { %3471 = vmatmul.mubr.f32.gmra.mxu0 %v1777_v46  ;;  %3515 = vmatprep.subr.mxu0 %v4817_v7 }
 0xcc5   :  { %3516 = vmatpush3.msra.mxu0 %v4817_v7 }
 0xcc6   :  { %3517 = vmatprep.subr.mxu0 %v4824_v61 }
 0xcc7   :  { %3518 = vmatpush3.msra.mxu0 %v4824_v61 }
 0xcc8   :  { %3519 = vmatprep.subr.mxu0 %v4831_v8 }
 0xcc9   :  { %3520 = vmatpush3.msra.mxu0 %v4831_v8 }
 0xcca   :  { %3521 = vmatprep.subr.mxu0 %v4838_v9 }
 0xccb   :  { %3522 = vmatpush3.msra.mxu0 %v4838_v9 }
 0xccc   :  { %3523 = vmatprep.subr.mxu0 %v4845_v10 }
 0xccd   :  { %3524 = vmatpush3.msra.mxu0 %v4845_v10 }
 0xcce   :  { %3525 = vmatprep.subr.mxu0 %v4354_v58 }
 0xccf   :  { %3526 = vmatpush3.msra.mxu0 %v4853_v12 }
 0xcd0   :  { %3533 = vmatprep.subr.mxu0 %v4803_v31 }
 0xd80   :  { %v3469_v58 = vpop.f32.mrf.mxu0 }
 0xd82   :  { %v1844_v25 = vpop.f32.mrf.mxu0 }
 0xd83   :  { %3505 = vmatprep.mubr.f32.mxu1 %v1844_v25  ;;  %v2169_v25 = vrot.slane %v4627_v62, %v1005_v32 }
 0xd84   :  { %v3472_v30 = vpop.f32.mrf.mxu0  ;;  %3506 = vmatmul.mubr.f32.vlgmr.msra.gmra.mxu1 %v3469_v58 }
 0xd85   :  { %3556 = vmatpush3.msra.mxu1 %v161_v47 }
 0xd86   :  { %v1854_v37 = vpop.f32.mrf.mxu0  ;;  %3557 = vmatprep.subr.mxu1 %v160_v48 }
 0xd87   :  { %3508 = vmatprep.mubr.f32.mxu1 %v1854_v37  ;;  %3558 = vmatpush3.msra.mxu1 %v160_v48 }
 0xd88   :  { %3509 = vmatmul.mubr.f32.gmra.mxu1 %v3472_v30  ;;  %3559 = vmatprep.subr.mxu1 %v159_v49 }
 0xd89   :  { %3560 = vmatpush3.msra.mxu1 %v159_v49 }
 0xd8a   :  { %3561 = vmatprep.subr.mxu1 %v158_v0 }
 0xd8b   :  { %3562 = vmatpush3.msra.mxu1 %v158_v0 }
 0xd8c   :  { %3563 = vmatprep.subr.mxu1 %v157_v22 }
 0xd8d   :  { %3564 = vmatpush3.msra.mxu1 %v157_v22 }
 0xd8e   :  { %3565 = vmatprep.subr.mxu1 %v156_v13 }
 0xd8f   :  { %3566 = vmatpush3.msra.mxu1 %v156_v13 }
 0xd90   :  { %3567 = vmatprep.subr.mxu1 %v155_v15 }
 0xd91   :  { %3568 = vmatpush3.msra.mxu1 %v155_v15 }
 0xd92   :  { %3569 = vmatprep.subr.mxu1 %v154_v57 }
 0xd93   :  { %3570 = vmatpush3.msra.mxu1 %v154_v57 }
 0xd94   :  { %3599 = vmatprep.subr.mxu1 %v4803_v31 }
 0xe44   :  { %v3507_v45 = vpop.f32.mrf.mxu1 }
 0xe45   :  { %v1939_v53 = vadd.f32 %v3507_v45, %v1866_v26 }
 0xe46   :  { %v1933_v42 = vpop.f32.mrf.mxu1 }
 0xe47   :  { %v1934_v44 = vadd.f32 %v1933_v42, %v1866_v26  ;;  %v1953_v40 = vadd.f32 %v1939_v53, %v4636_v41  ;;  %v2177_v42 = vrot.slane %v4627_v62, %v1013_v34 }
 0xe48   :  { %v3510_v51 = vpop.f32.mrf.mxu1 }
 0xe49   :  { %v1952_v24 = vadd.f32 %v1934_v44, %v4633_v43  ;;  %v1949_v1 = vadd.f32 %v3510_v51, %v1866_v26 }
 0xe4a   :  { %v1943_v2 = vpop.f32.mrf.mxu1 }
 0xe4b   :  { %v1944_v3 = vadd.f32 %v1943_v2, %v1866_v26  ;;  %3527 = vmatprep.mubr.msk.f32.mxu0 %vm190_vm0, %v1952_v24  ;;  %v1955_v59 = vadd.f32 %v1949_v1, %v4647_v4 }
 0xe4c   :  { %3528 = vmatmul.mubr.msk.f32.vlgmr.msra.gmra.mxu0 %vm190_vm0, %v1953_v40 }
 0xe4d   :  { %v1954_v6 = vadd.f32 %v1944_v3, %v4642_v52  ;;  %3534 = vmatpush3.msra.mxu0 %v4803_v31 }
 0xe4e   :  { %3535 = vmatprep.subr.mxu0 %v4810_v5 }
 0xe4f   :  { %3530 = vmatprep.mubr.msk.f32.mxu0 %vm190_vm0, %v1954_v6  ;;  %3536 = vmatpush3.msra.mxu0 %v4810_v5 }
 0xe50   :  { %3531 = vmatmul.mubr.msk.f32.gmra.mxu0 %vm190_vm0, %v1955_v59  ;;  %3537 = vmatprep.subr.mxu0 %v4817_v7 }
 0xe51   :  { %3538 = vmatpush3.msra.mxu0 %v4817_v7 }
 0xe52   :  { %3539 = vmatprep.subr.mxu0 %v4824_v61 }
 0xe53   :  { %3540 = vmatpush3.msra.mxu0 %v4824_v61 }
 0xe54   :  { %3541 = vmatprep.subr.mxu0 %v4831_v8 }
 0xe55   :  { %3542 = vmatpush3.msra.mxu0 %v4831_v8 }
 0xe56   :  { %3543 = vmatprep.subr.mxu0 %v4838_v9 }
 0xe57   :  { %3544 = vmatpush3.msra.mxu0 %v4838_v9 }
 0xe58   :  { %3545 = vmatprep.subr.mxu0 %v4845_v10 }
 0xe59   :  { %3546 = vmatpush3.msra.mxu0 %v4845_v10 }
 0xe5a   :  { %3547 = vmatprep.subr.mxu0 %v4853_v12 }
 0xe5b   :  { %3548 = vmatpush3.msra.mxu0 %v4853_v12 }
 0xe5c   :  { %3577 = vmatprep.subr.mxu0 %v169_v14 }
 0xf0c   :  { %v3529_v43 = vpop.f32.mrf.mxu0 }
 0xf0d   :  { %v4889_v41 = vsub.f32 %v1953_v40, %v3529_v43  ;;  %v164_v43 = vld [vmem:[%s5072_s6 + $0x1d0] sm:$0xff] }
 0xf0e   :  { %v2034_v52 = vpop.f32.mrf.mxu0 }
 0xf0f   :  { %v4891_v4 = vsub.f32 %v1952_v24, %v2034_v52  ;;  %v2058_v19 = vmul.f32 %v4889_v41, %v4889_v41  ;;  %v162_v52 = vld [vmem:[%s5072_s6 + $0x1c0] sm:$0xff] }
 0xf10   :  { %v3532_v16 = vpop.f32.mrf.mxu0 }
 0xf11   :  { %v2057_v17 = vmul.f32 %v4891_v4, %v4891_v4  ;;  %v4897_v20 = vsub.f32 %v1955_v59, %v3532_v16  ;;  %v165_v59 = vld [vmem:[%s5072_s6 + $0x1d8] sm:$0xff] }
 0xf12   :  { %v2044_v35 = vpop.f32.mrf.mxu0 }
 0xf13   :  { %v4899_v36 = vsub.f32 %v1954_v6, %v2044_v35  ;;  %3549 = vmatprep.mubr.msk.f32.mxu0 %vm190_vm0, %v2057_v17  ;;  %v2060_v39 = vmul.f32 %v4897_v20, %v4897_v20 }
 0xf14   :  { %3550 = vmatmul.mubr.msk.f32.vlgmr.msra.gmra.mxu0 %vm190_vm0, %v2058_v19 }
 0xf15   :  { %v2059_v38 = vmul.f32 %v4899_v36, %v4899_v36  ;;  %3578 = vmatpush3.msra.mxu0 %v169_v14 }
 0xf16   :  { %3579 = vmatprep.subr.mxu0 %v168_v21 }
 0xf17   :  { %3552 = vmatprep.mubr.msk.f32.mxu0 %vm190_vm0, %v2059_v38  ;;  %3580 = vmatpush3.msra.mxu0 %v168_v21 }
 0xf18   :  { %3553 = vmatmul.mubr.msk.f32.gmra.mxu0 %vm190_vm0, %v2060_v39  ;;  %3581 = vmatprep.subr.mxu0 %v167_v27 }
 0xf19   :  { %3582 = vmatpush3.msra.mxu0 %v167_v27 }
 0xf1a   :  { %3583 = vmatprep.subr.mxu0 %v166_v55 }
 0xf1b   :  { %3584 = vmatpush3.msra.mxu0 %v166_v55 }
 0xf1c   :  { %3585 = vmatprep.subr.mxu0 %v165_v59 }
 0xf1d   :  { %3586 = vmatpush3.msra.mxu0 %v165_v59 }
 0xf1e   :  { %3587 = vmatprep.subr.mxu0 %v164_v43 }
 0xf1f   :  { %3588 = vmatpush3.msra.mxu0 %v164_v43 }
 0xfd4   :  { %v3551_v28 = vpop.f32.mrf.mxu0 }
 0xfd5   :  { %v2145_v33 = vadd.f32 1e-05, %v3551_v28 }
 0xfd6   :  { %v2139_v18 = vpop.f32.mrf.mxu0 }
 0xfd7   :  { %3711 = vrsqrt.f32 %v2145_v33  ;;  %v2140_v54 = vadd.f32 1e-05, %v2139_v18 }
 0xfd8   :  { %v3554_v29 = vpop.f32.mrf.mxu0 }
 0xfd9   :  { %3713 = vrsqrt.f32 %v2140_v54  ;;  %v2155_v46 = vadd.f32 1e-05, %v3554_v29 }
 0xfda   :  { %v2149_v63 = vpop.f32.mrf.mxu0 }
 0xfdb   :  { %3715 = vrsqrt.f32 %v2155_v46  ;;  %v2150_v11 = vadd.f32 1e-05, %v2149_v63 }
 0xfdd   :  { %3717 = vrsqrt.f32 %v2150_v11 }
 0xfe4   :  { %v3712_v58 = vpop.eup %3711 }
 0xfe5   :  { %v2163_v30 = vmul.f32 %v3712_v58, %v4889_v41  ;;  %v163_v41 = vld [vmem:[%s5072_s6 + $0x1c8] sm:$0xff] }
 0xfe6   :  { %v3714_v37 = vpop.eup %3713  ;;  %3589 = vmatprep.subr.mxu0 %v163_v41 }
 0xfe7   :  { %v2162_v26 = vmul.f32 %v3714_v37, %v4891_v4  ;;  %v2171_v53 = vmul.f32 %v2169_v25, %v2163_v30  ;;  %3590 = vmatpush3.msra.mxu0 %v163_v41  ;;  %v2185_v4 = vrot.slane %v4627_v62, %v1021_v60  ;;  %v2290_v60 = vrot.slane %v4627_v62, %v1126_v23 }
 0xfe8   :  { %v3716_v45 = vpop.eup %3715  ;;  %3591 = vmatprep.subr.mxu0 %v162_v52 }
 0xfe9   :  { %v2170_v44 = vmul.f32 %v2169_v25, %v2162_v26  ;;  %v2165_v51 = vmul.f32 %v3716_v45, %v4897_v20  ;;  %v4958_v32 = vadd.f32 %v2177_v42, %v2171_v53  ;;  %3592 = vmatpush3.msra.mxu0 %v162_v52 }
 0xfea   :  { %v3718_v24 = vpop.eup %3717  ;;  %3621 = vmatprep.subr.mxu0 %v4803_v31 }
 0xfeb   :  { %v4955_v40 = vadd.f32 %v2177_v42, %v2170_v44  ;;  %v2164_v1 = vmul.f32 %v3718_v24, %v4899_v36  ;;  %v2173_v2 = vmul.f32 %v2169_v25, %v2165_v51 }
 0xfed   :  { %3571 = vmatprep.mubr.msk.f32.mxu1 %vm190_vm0, %v4955_v40  ;;  %v2172_v3 = vmul.f32 %v2169_v25, %v2164_v1  ;;  %v4967_v34 = vadd.f32 %v2177_v42, %v2173_v2 }
 0xfee   :  { %3572 = vmatmul.mubr.msk.f32.vlgmr.msra.gmra.mxu1 %vm190_vm0, %v4958_v32 }
 0xfef   :  { %v4964_v6 = vadd.f32 %v2177_v42, %v2172_v3  ;;  %3600 = vmatpush3.msra.mxu1 %v4803_v31  ;;  %v2605_v42 = vrot.slane %v4627_v62, %v1441_v56 }
 0xff0   :  { %3601 = vmatprep.subr.mxu1 %v4810_v5 }
 0xff1   :  { %3574 = vmatprep.mubr.msk.f32.mxu1 %vm190_vm0, %v4964_v6  ;;  %3602 = vmatpush3.msra.mxu1 %v4810_v5 }
 0xff2   :  { %3575 = vmatmul.mubr.msk.f32.gmra.mxu1 %vm190_vm0, %v4967_v34  ;;  %3603 = vmatprep.subr.mxu1 %v4817_v7 }
 0xff3   :  { %3604 = vmatpush3.msra.mxu1 %v4817_v7 }
 0xff4   :  { %3605 = vmatprep.subr.mxu1 %v4824_v61 }
 0xff5   :  { %3606 = vmatpush3.msra.mxu1 %v4824_v61 }
 0xff6   :  { %3607 = vmatprep.subr.mxu1 %v4831_v8 }
 0xff7   :  { %3608 = vmatpush3.msra.mxu1 %v4831_v8 }
 0xff8   :  { %3609 = vmatprep.subr.mxu1 %v4838_v9 }
 0xff9   :  { %3610 = vmatpush3.msra.mxu1 %v4838_v9 }
 0xffa   :  { %3611 = vmatprep.subr.mxu1 %v4845_v10 }
 0xffb   :  { %3612 = vmatpush3.msra.mxu1 %v4845_v10 }
 0xffc   :  { %3613 = vmatprep.subr.mxu1 %v4853_v12 }
 0xffd   :  { %3614 = vmatpush3.msra.mxu1 %v4853_v12 }
 0xffe   :  { %3643 = vmatprep.subr.mxu1 %v4803_v31 }
0x10ae   :  { %v3573_v16 = vpop.f32.mrf.mxu1 }
0x10af   :  { %v2270_v17 = vadd.f32 %v3573_v16, %v2185_v4 }
0x10b0   :  { %v2264_v19 = vpop.f32.mrf.mxu1 }
0x10b1   :  { %v2265_v20 = vadd.f32 %v2264_v19, %v2185_v4  ;;  %v2284_v38 = vmax.f32 %v2270_v17, 0.0 }
0x10b2   :  { %v3576_v35 = vpop.f32.mrf.mxu1 }
0x10b3   :  { %v2283_v36 = vmax.f32 %v2265_v20, 0.0  ;;  %v2280_v39 = vadd.f32 %v3576_v35, %v2185_v4 }
0x10b4   :  { %v2274_v47 = vpop.f32.mrf.mxu1 }
0x10b5   :  { %v2275_v48 = vadd.f32 %v2274_v47, %v2185_v4  ;;  %3593 = vmatprep.mubr.msk.f32.mxu0 %vm190_vm0, %v2283_v36  ;;  %v2286_v0 = vmax.f32 %v2280_v39, 0.0 }
0x10b6   :  { %3594 = vmatmul.mubr.msk.f32.vlgmr.msra.gmra.mxu0 %vm190_vm0, %v2284_v38 }
0x10b7   :  { %v2285_v49 = vmax.f32 %v2275_v48, 0.0  ;;  %3622 = vmatpush3.msra.mxu0 %v4803_v31 }
0x10b8   :  { %3623 = vmatprep.subr.mxu0 %v4810_v5 }
0x10b9   :  { %3596 = vmatprep.mubr.msk.f32.mxu0 %vm190_vm0, %v2285_v49  ;;  %3624 = vmatpush3.msra.mxu0 %v4810_v5 }
0x10ba   :  { %3597 = vmatmul.mubr.msk.f32.gmra.mxu0 %vm190_vm0, %v2286_v0  ;;  %3625 = vmatprep.subr.mxu0 %v4817_v7 }
0x10bb   :  { %3626 = vmatpush3.msra.mxu0 %v4817_v7 }
0x10bc   :  { %3627 = vmatprep.subr.mxu0 %v4824_v61 }
0x10bd   :  { %3628 = vmatpush3.msra.mxu0 %v4824_v61 }
0x10be   :  { %3629 = vmatprep.subr.mxu0 %v4831_v8 }
0x10bf   :  { %3630 = vmatpush3.msra.mxu0 %v4831_v8 }
0x10c0   :  { %3631 = vmatprep.subr.mxu0 %v4838_v9 }
0x10c1   :  { %3632 = vmatpush3.msra.mxu0 %v4838_v9 }
0x10c2   :  { %3633 = vmatprep.subr.mxu0 %v4845_v10 }
0x10c3   :  { %3634 = vmatpush3.msra.mxu0 %v4845_v10 }
0x10c4   :  { %3635 = vmatprep.subr.mxu0 %v4853_v12 }
0x10c5   :  { %3636 = vmatpush3.msra.mxu0 %v4853_v12 }
0x1176   :  { %v3595_v22 = vpop.f32.mrf.mxu0 }
0x1177   :  { %v2375_v13 = vadd.f32 %v3595_v22, %v2290_v60 }
0x1178   :  { %v2369_v15 = vpop.f32.mrf.mxu0 }
0x1179   :  { %v2370_v57 = vadd.f32 %v2369_v15, %v2290_v60  ;;  %v2389_v27 = vadd.f32 %v2375_v13, %v4958_v32 }
0x117a   :  { %v3598_v14 = vpop.f32.mrf.mxu0 }
0x117b   :  { %v2388_v21 = vadd.f32 %v2370_v57, %v4955_v40  ;;  %v2385_v55 = vadd.f32 %v3598_v14, %v2290_v60  ;;  %v2702_v40 = vld [vmem:[%s5073_s7 + $0x20] ss:$0 sm:$0xff]  ;;  %s3756_s7 = scalar_lea.vmem %s2632_s14, 512 }
0x117c   :  { %v2379_v28 = vpop.f32.mrf.mxu0  ;;  %p3757_p0 = scmp.ne.s32.totalorder %s2632_s14, %s3756_s7  ;;  %p3762_p2 = scmp.lt.s32.totalorder %s3756_s7, %s3756_s7 }
0x117d   :  { %v2380_v33 = vadd.f32 %v2379_v28, %v2290_v60  ;;  %3615 = vmatprep.mubr.msk.f32.mxu1 %vm190_vm0, %v2388_v21  ;;  %v2391_v23 = vadd.f32 %v2385_v55, %v4967_v34 }
0x117e   :  { %3616 = vmatmul.mubr.msk.f32.vlgmr.msra.gmra.mxu1 %vm190_vm0, %v2389_v27  ;;  %p3763_p3 = por %p3762_p2, %p3761_p1 }
0x117f   :  { %v2390_v18 = vadd.f32 %v2380_v33, %v4964_v6  ;;  %3651 = vmatpush3.msra.mxu1 %v4803_v31 }
0x1180   :  { %3644 = vmatprep.subr.mxu1 %v4810_v5  ;;  %p3764_p4 = pnand %p3763_p3, %p3757_p0 }
0x1181   :  { %3618 = vmatprep.mubr.msk.f32.mxu1 %vm190_vm0, %v2390_v18  ;;  %3652 = vmatpush3.msra.mxu1 %v4810_v5 }
0x1182   :  { %3619 = vmatmul.mubr.msk.f32.gmra.mxu1 %vm190_vm0, %v2391_v23  ;;  %3645 = vmatprep.subr.mxu1 %v4817_v7 }
0x1183   :  { %3653 = vmatpush3.msra.mxu1 %v4817_v7 }
0x1184   :  { %3646 = vmatprep.subr.mxu1 %v4824_v61 }
0x1185   :  { %3654 = vmatpush3.msra.mxu1 %v4824_v61 }
0x1186   :  { %3647 = vmatprep.subr.mxu1 %v4831_v8 }
0x1187   :  { %3655 = vmatpush3.msra.mxu1 %v4831_v8 }
0x1188   :  { %3648 = vmatprep.subr.mxu1 %v4838_v9 }
0x1189   :  { %3656 = vmatpush3.msra.mxu1 %v4838_v9 }
0x118a   :  { %3649 = vmatprep.subr.mxu1 %v4845_v10 }
0x118b   :  { %3657 = vmatpush3.msra.mxu1 %v4845_v10 }
0x118c   :  { %3650 = vmatprep.subr.mxu1 %v4853_v12 }
0x118d   :  { %3658 = vmatpush3.msra.mxu1 %v4853_v12 }
0x123e   :  { %v3617_v31 = vpop.f32.mrf.mxu1 }
0x123f   :  { %v2490_v5 = vsub.f32 %v2389_v27, %v3617_v31 }
0x1240   :  { %v2470_v7 = vpop.f32.mrf.mxu1 }
0x1241   :  { %v2489_v61 = vsub.f32 %v2388_v21, %v2470_v7  ;;  %v2494_v46 = vmul.f32 %v2490_v5, %v2490_v5 }
0x1242   :  { %v3620_v54 = vpop.f32.mrf.mxu1 }
0x1243   :  { %v2493_v29 = vmul.f32 %v2489_v61, %v2489_v61  ;;  %v2492_v8 = vsub.f32 %v2391_v23, %v3620_v54 }
0x1244   :  { %v2480_v63 = vpop.f32.mrf.mxu1 }
0x1245   :  { %v2491_v11 = vsub.f32 %v2390_v18, %v2480_v63  ;;  %3637 = vmatprep.mubr.msk.f32.mxu0 %vm190_vm0, %v2493_v29  ;;  %v2496_v10 = vmul.f32 %v2492_v8, %v2492_v8 }
0x1246   :  { %3638 = vmatmul.mubr.msk.f32.vlgmr.msra.gmra.mxu0 %vm190_vm0, %v2494_v46 }
0x1247   :  { %v2495_v9 = vmul.f32 %v2491_v11, %v2491_v11 }
0x1249   :  { %3640 = vmatprep.mubr.msk.f32.mxu1 %vm190_vm0, %v2495_v9 }
0x124a   :  { %3641 = vmatmul.mubr.msk.f32.vlgmr.msra.gmra.mxu1 %vm190_vm0, %v2496_v10 }
0x1306   :  { %v3639_v12 = vpop.f32.mrf.mxu0 }
0x1307   :  { %v2581_v58 = vadd.f32 1e-05, %v3639_v12 }
0x1308   :  { %v2575_v25 = vpop.f32.mrf.mxu0 }
0x1309   :  { %3719 = vrsqrt.f32 %v2581_v58  ;;  %v2576_v30 = vadd.f32 1e-05, %v2575_v25 }
0x130a   :  { %v3642_v37 = vpop.f32.mrf.mxu1 }
0x130b   :  { %3721 = vrsqrt.f32 %v2576_v30  ;;  %v2591_v26 = vadd.f32 1e-05, %v3642_v37 }
0x130c   :  { %v2585_v45 = vpop.f32.mrf.mxu1 }
0x130d   :  { %3723 = vrsqrt.f32 %v2591_v26  ;;  %v2586_v53 = vadd.f32 1e-05, %v2585_v45 }
0x130f   :  { %3725 = vrsqrt.f32 %v2586_v53 }
0x1316   :  { %v3720_v44 = vpop.eup %3719 }
0x1317   :  { %v2599_v51 = vmul.f32 %v3720_v44, %v2490_v5 }
0x1318   :  { %v3722_v24 = vpop.eup %3721 }
0x1319   :  { %v2607_v1 = vmul.f32 %v2605_v42, %v2599_v51  ;;  %v2598_v32 = vmul.f32 %v3722_v24, %v2489_v61 }
0x131a   :  { %v3724_v2 = vpop.eup %3723 }
0x131b   :  { %v2606_v3 = vmul.f32 %v2605_v42, %v2598_v32  ;;  %v2601_v6 = vmul.f32 %v3724_v2, %v2492_v8  ;;  %v2615_v34 = vadd.f32 %v2702_v40, %v2607_v1 }
0x131c   :  { %v3726_v59 = vpop.eup %3725 }
0x131d   :  { %v2609_v43 = vmul.f32 %v2605_v42, %v2601_v6  ;;  %v2600_v41 = vmul.f32 %v3726_v59, %v2491_v11  ;;  %v2614_v52 = vadd.f32 %v2702_v40, %v2606_v3  ;;  %v2619_v50 = vmax.f32 %v2615_v34, 0.0 }
0x131f   :  { %v2608_v4 = vmul.f32 %v2605_v42, %v2600_v41  ;;  %v2617_v56 = vadd.f32 %v2702_v40, %v2609_v43  ;;  %v2618_v62 = vmax.f32 %v2614_v52, 0.0  ;;  %2623 = vst.msk [vmem:[#allocation2 + $0x8] sm:$0xff] %vm190_vm0, %v2619_v50 }
0x1321   :  { %v2616_v16 = vadd.f32 %v2702_v40, %v2608_v4  ;;  %v2621_v17 = vmax.f32 %v2617_v56, 0.0  ;;  %2622 = vst.msk [vmem:[#allocation2] sm:$0xff] %vm190_vm0, %v2618_v62 }
0x1323   :  { %v2620_v19 = vmax.f32 %v2616_v16, 0.0  ;;  %2625 = vst.msk [vmem:[#allocation2 + $0x18] sm:$0xff] %vm190_vm0, %v2621_v17 }
0x1325   :  { %2624 = vst.msk [vmem:[#allocation2 + $0x10] sm:$0xff] %vm190_vm0, %v2620_v19 }
0x1326   :  { %3767 = shalt.err (!%p3764_p4)
}
0x1327   :  { %s3780_s15 = smov 128   ;;  %s3781_s2 = smov 8  }
0x1328   :  { %2637 = dma.vmem_to_hbm [thread:$0]  %s2632_s14, 512, %s5074_s8, [#allocation3], %s3780_s15, %s3780_s15, %s3781_s2  }
0x1329   :  { %3776 = dma.done.wait [#allocation3], 512  }
0x132a   :  { %3777 = vsyncadd [#allocation3], 4294966784 }
0x132b   :  { %2641 = vsyncpa [#allocation3], 1 }

</bundles_post_ra>
